<compile_context>
chip_gen: v6e
topology: v6e:2x2x1
jax: 0.10.0
libtpu: 0.0.40
codegen_flags: <defaults>
</compile_context>

<pallas_src>
import math
from functools import partial

import jax
import jax.numpy as jnp
from jax.experimental import pallas as pl
from jax.experimental.pallas import tpu as pltpu


def _round_up(x, m):
    return ((x + m - 1) // m) * m


# -----------------------------------------------------------------------------
# Fused Pallas kernel.  One grid step = (one batch element, one ResidualBlock).
# -----------------------------------------------------------------------------
def _mamba_stack_kernel(
    x_ref,      # (1, L, d_model)            embedded input (f32), per-batch block
    nw_ref,     # (1, 1, d_model)            layer RMSNorm weight (f32)
    win_ref,    # (1, d_model, 2*d_inner)    fused in_proj [x | res] (bf16)
    cw_ref,     # (1, d_conv, d_inner)       depthwise conv weight (f32)
    wx_ref,     # (1, d_inner, d_inner+2n)   fused x_proj [dt(folded) | B | C] (bf16)
    vec_ref,    # (1, 3, d_inner)            rows: conv bias, dt bias, D (f32)
    alogT_ref,  # (1, n, d_inner)            A_log transposed (f32)
    wout_ref,   # (1, d_inner, d_model)      out_proj (bf16)
    fnw_ref,    # (1, d_model)               final RMSNorm weight (f32)
    wol_ref,    # (d_model, c_out_pad)       out_layer, zero-padded lanes (bf16)
    o_ref,      # (1, L, c_out_pad)          output (f32)
    x_s,        # VMEM (L, d_model) f32      carried residual stream
    *,
    scan_chunk,
):
    layer = pl.program_id(1)
    n_layers = pl.num_programs(1)
    L, d_model = x_s.shape
    d_conv, d_inner = cw_ref.shape[1], cw_ref.shape[2]
    n = alogT_ref.shape[1]
    eps = 1e-5

    # First layer of this batch element: load the residual stream.
    @pl.when(layer == 0)
    def _():
        x_s[...] = x_ref[0]

    x = x_s[...]                                             # (L, d_model) f32

    # --- RMSNorm (pre-norm of the ResidualBlock) ---
    ms = jnp.mean(x * x, axis=-1, keepdims=True)
    xn = (x * jax.lax.rsqrt(ms + eps) * nw_ref[0]).astype(jnp.bfloat16)

    # --- fused in_proj: single bf16 MXU pass, f32 accumulation ---
    xz_res = jnp.dot(xn, win_ref[0], preferred_element_type=jnp.float32)  # (L, 2*d_inner)
    xz = xz_res[:, :d_inner]
    res = xz_res[:, d_inner:]

    # --- depthwise causal conv1d on register values (no padded scratch) ---
    cw = cw_ref[0]                                           # (d_conv, d_inner)
    vec = vec_ref[0]                                         # (3, d_inner)
    conv_b, dt_b, dvec = vec[0:1, :], vec[1:2, :], vec[2:3, :]
    acc = conv_b + xz * cw[d_conv - 1:d_conv, :]             # tap with zero shift
    for k in range(d_conv - 1):
        shift = d_conv - 1 - k
        shifted = jnp.concatenate(
            [jnp.zeros((shift, d_inner), jnp.float32), xz[:L - shift, :]], axis=0)
        acc = acc + shifted * cw[k:k + 1, :]
    u = acc * jax.nn.sigmoid(acc)                            # SiLU -> SSM input

    # --- fused x_proj: [dt (dt_proj folded) | B | C] in one MXU pass ---
    u_b = u.astype(jnp.bfloat16)
    proj = jnp.dot(u_b, wx_ref[0], preferred_element_type=jnp.float32)  # (L, d_inner+2n)
    dt = proj[:, :d_inner] + dt_b
    Bm = proj[:, d_inner:d_inner + n]
    Cm = proj[:, d_inner + n:d_inner + 2 * n]
    # numerically stable softplus
    delta = jnp.log1p(jnp.exp(-jnp.abs(dt))) + jnp.maximum(dt, 0.0)     # (L, d_inner)
    du = delta * u
    A_neg = -jnp.exp(alogT_ref[0])                                      # (n, d_inner)

    # --- selective scan: chunked over L, state in registers, per-step C
    #     contraction as a sublane (XLU) reduce; ragged last chunk OK ---
    st = jnp.zeros((n, d_inner), jnp.float32)
    y_chunks = []
    for c0 in range(0, L, scan_chunk):
        lc = min(scan_chunk, L - c0)
        dA_c = jnp.exp(delta[c0:c0 + lc, None, :] * A_neg[None, :, :])   # (lc, n, d_inner)
        dBu_c = du[c0:c0 + lc, None, :] * Bm[c0:c0 + lc, :, None]        # (lc, n, d_inner)
        C3 = Cm[c0:c0 + lc, :, None]                                     # (lc, n, 1)
        ys = []
        for i in range(lc):
            st = dA_c[i] * st + dBu_c[i]                                 # (n, d_inner)
            ys.append(jnp.sum(st * C3[i], axis=0, keepdims=True))        # (1, d_inner)
        y_chunks.append(jnp.concatenate(ys, axis=0))                     # (lc, d_inner)
    y = y_chunks[0] if len(y_chunks) == 1 else jnp.concatenate(y_chunks, axis=0)

    y = y + u * dvec                                          # + u * D
    y = y * (res * jax.nn.sigmoid(res))                       # gate with SiLU(res)
    out = jnp.dot(y.astype(jnp.bfloat16), wout_ref[0],
                  preferred_element_type=jnp.float32)         # (L, d_model)
    x_new = out + x                                           # residual connection
    x_s[...] = x_new

    # --- final RMSNorm + out_layer (lane-dense, zero-padded c_out) ---
    @pl.when(layer == n_layers - 1)
    def _():
        ms2 = jnp.mean(x_new * x_new, axis=-1, keepdims=True)
        xn2 = (x_new * jax.lax.rsqrt(ms2 + eps) * fnw_ref[...]).astype(jnp.bfloat16)
        o_ref[0] = jnp.dot(xn2, wol_ref[...], preferred_element_type=jnp.float32)


# -----------------------------------------------------------------------------
# pallas_call wrapper
# -----------------------------------------------------------------------------
def mamba_stack(x, kp):
    B, L, d_model = x.shape
    e_layers = kp["w_in"].shape[0]
    d_inner = kp["w_in"].shape[2] // 2
    d_conv = kp["conv_w"].shape[1]
    n = kp["A_log_T"].shape[1]
    c_out_pad = kp["w_ol"].shape[1]
    scan_chunk = min(L, 64)

    def wspec(shape):
        nd = len(shape)
        return pl.BlockSpec((1,) + tuple(shape[1:]),
                            lambda b, l, _nd=nd: (l,) + (0,) * (_nd - 1))

    in_specs = [
        pl.BlockSpec((1, L, d_model), lambda b, l: (b, 0, 0)),   # x (per batch)
        wspec(kp["norm_w"].shape),                               # per-layer weights
        wspec(kp["w_in"].shape),
        wspec(kp["conv_w"].shape),
        wspec(kp["w_x"].shape),
        wspec(kp["vecs"].shape),
        wspec(kp["A_log_T"].shape),
        wspec(kp["w_out"].shape),
        pl.BlockSpec(tuple(kp["final_norm_w"].shape), lambda b, l: (0, 0)),
        pl.BlockSpec(tuple(kp["w_ol"].shape), lambda b, l: (0, 0)),
    ]
    out_spec = pl.BlockSpec((1, L, c_out_pad), lambda b, l: (b, 0, 0))

    return pl.pallas_call(
        partial(_mamba_stack_kernel, scan_chunk=scan_chunk),
        out_shape=jax.ShapeDtypeStruct((B, L, c_out_pad), jnp.float32),
        grid_spec=pltpu.PrefetchScalarGridSpec(
            num_scalar_prefetch=0,
            grid=(B, e_layers),
            in_specs=in_specs,
            out_specs=out_spec,
            scratch_shapes=[pltpu.VMEM((L, d_model), jnp.float32)],  # residual stream
        ),
        compiler_params=pltpu.CompilerParams(
            dimension_semantics=("parallel", "arbitrary")),
    )(x, kp["norm_w"], kp["w_in"], kp["conv_w"], kp["w_x"], kp["vecs"],
      kp["A_log_T"], kp["w_out"], kp["final_norm_w"], kp["w_ol"])


# -----------------------------------------------------------------------------
# Offline weight packing: fuse in_proj, fuse x_proj + fold dt_proj, pack the
# per-layer bias/D vectors, zero-pad out_layer to a 128-lane c_out.
# -----------------------------------------------------------------------------
def pack_params(raw, c_out_pad):
    lp = raw["layers"]
    bf = jnp.bfloat16
    w_in = jnp.concatenate([lp["w_in_x"], lp["w_in_r"]], axis=-1).astype(bf)
    # dt = (u @ w_x_dt) @ w_dt + b_dt  ==  u @ (w_x_dt @ w_dt) + b_dt  (exact fold)
    w_dt_folded = jnp.einsum("eir,erj->eij", lp["w_x_dt"], lp["w_dt"])
    w_x = jnp.concatenate([w_dt_folded, lp["w_x_B"], lp["w_x_C"]], axis=-1).astype(bf)
    vecs = jnp.concatenate([lp["conv_b"], lp["b_dt"], lp["D"]], axis=1)  # (e, 3, d_inner)
    d_model, c_out = raw["W_ol"].shape
    w_ol = jnp.zeros((d_model, c_out_pad), jnp.float32).at[:, :c_out].set(raw["W_ol"])
    return dict(
        norm_w=lp["norm_w"],
        w_in=w_in,
        conv_w=lp["conv_w"],
        w_x=w_x,
        vecs=vecs,
        A_log_T=lp["A_log_T"],
        w_out=lp["w_out"].astype(bf),
        final_norm_w=raw["norm_w"],
        w_ol=w_ol.astype(bf),
    )


# -----------------------------------------------------------------------------
# Plain-JAX glue: DataEmbedding.
# TODO(synk): DataEmbedding source was not provided; reproduced as the standard
# TSLib variant (circular token Conv1d + sinusoidal PE + timeF linear, dropout=0).
# -----------------------------------------------------------------------------
def data_embedding(x_enc, x_mark, w_tok, w_time, d_model):
    emb = jnp.zeros(x_enc.shape[:2] + (d_model,), jnp.float32)
    for k in range(3):
        emb = emb + jnp.einsum("blc,cd->bld", jnp.roll(x_enc, 1 - k, axis=1), w_tok[k])
    L = x_enc.shape[1]
    pos = jnp.arange(L, dtype=jnp.float32)[:, None]
    div = jnp.exp(jnp.arange(0, d_model, 2, dtype=jnp.float32)
                  * (-math.log(10000.0) / d_model))
    pe = jnp.zeros((L, d_model), jnp.float32)
    pe = pe.at[:, 0::2].set(jnp.sin(pos * div))
    pe = pe.at[:, 1::2].set(jnp.cos(pos * div))
    temb = jnp.einsum("blm,md->bld", x_mark, w_time)
    return emb + temb + pe[None]


# -----------------------------------------------------------------------------
# Full model forward ('long_term_forecast' path)
# -----------------------------------------------------------------------------
def model_forward(x_enc, x_mark_enc, params, pred_len, d_model, c_out):
    mean_enc = jnp.mean(x_enc, axis=1, keepdims=True)
    x = x_enc - mean_enc
    std_enc = jnp.sqrt(jnp.var(x, axis=1, keepdims=True) + 1e-5)
    x = x / std_enc

    x = data_embedding(x, x_mark_enc, params["W_tok"], params["W_time"], d_model)
    x_out = mamba_stack(x, params["kernel"])        # all layers + final norm + out_layer
    x_out = x_out[:, :, :c_out]                      # drop lane padding
    x_out = x_out * std_enc + mean_enc
    return x_out[:, -pred_len:, :]


# -----------------------------------------------------------------------------
# Pure-JAX f32 reference (unfused / unfolded) for tolerance validation.
# -----------------------------------------------------------------------------
def model_forward_ref(x_enc, x_mark_enc, raw, pred_len, d_model):
    mean_enc = jnp.mean(x_enc, axis=1, keepdims=True)
    xc = x_enc - mean_enc
    std_enc = jnp.sqrt(jnp.var(xc, axis=1, keepdims=True) + 1e-5)
    x = data_embedding(xc / std_enc, x_mark_enc, raw["W_tok"], raw["W_time"], d_model)

    lp = raw["layers"]
    e_layers, d_conv, d_inner = lp["conv_w"].shape
    n = lp["A_log_T"].shape[1]
    L = x.shape[1]
    eps = 1e-5
    for l in range(e_layers):
        h = x * jax.lax.rsqrt(jnp.mean(x * x, -1, keepdims=True) + eps) * lp["norm_w"][l]
        xz = h @ lp["w_in_x"][l]
        res = h @ lp["w_in_r"][l]
        xp = jnp.pad(xz, ((0, 0), (d_conv - 1, 0), (0, 0)))
        conv = lp["conv_b"][l] + sum(xp[:, k:k + L, :] * lp["conv_w"][l][k]
                                     for k in range(d_conv))
        u = conv * jax.nn.sigmoid(conv)
        dt_low = u @ lp["w_x_dt"][l]
        Bm = u @ lp["w_x_B"][l]
        Cm = u @ lp["w_x_C"][l]
        delta = jax.nn.softplus(dt_low @ lp["w_dt"][l] + lp["b_dt"][l])
        A_neg = -jnp.exp(lp["A_log_T"][l])                       # (n, d_inner)
        du = delta * u
        st = jnp.zeros((x.shape[0], n, d_inner), jnp.float32)
        ys = []
        for t in range(L):
            dA_t = jnp.exp(delta[:, t, None, :] * A_neg[None])   # (B, n, d_inner)
            dBu_t = du[:, t, None, :] * Bm[:, t, :, None]
            st = dA_t * st + dBu_t
            ys.append(jnp.sum(st * Cm[:, t, :, None], axis=1))   # (B, d_inner)
        y = jnp.stack(ys, axis=1) + u * lp["D"][l]
        y = y * (res * jax.nn.sigmoid(res))
        x = y @ lp["w_out"][l] + x
    x = x * jax.lax.rsqrt(jnp.mean(x * x, -1, keepdims=True) + eps) * raw["norm_w"]
    out = (x @ raw["W_ol"]) * std_enc + mean_enc
    return out[:, -pred_len:, :]


# -----------------------------------------------------------------------------
# Deterministic parameter construction (math layout: (in_features, out_features))
# -----------------------------------------------------------------------------
def init_params(key, *, enc_in, d_model, d_inner, dt_rank, n, d_conv, c_out,
                d_mark, e_layers):
    keys = iter(jax.random.split(key, 16))

    def rnd(shape, scale=0.05):
        return jax.random.normal(next(keys), shape, jnp.float32) * scale

    a_log_t = jnp.log(jnp.arange(1, n + 1, dtype=jnp.float32))[None, :, None] \
        * jnp.ones((e_layers, 1, d_inner), jnp.float32)

    layers = dict(
        norm_w=jnp.ones((e_layers, 1, d_model), jnp.float32),
        w_in_x=rnd((e_layers, d_model, d_inner)),
        w_in_r=rnd((e_layers, d_model, d_inner)),
        conv_w=rnd((e_layers, d_conv, d_inner)),
        conv_b=rnd((e_layers, 1, d_inner), 0.01),
        w_x_dt=rnd((e_layers, d_inner, dt_rank)),
        w_x_B=rnd((e_layers, d_inner, n)),
        w_x_C=rnd((e_layers, d_inner, n)),
        w_dt=rnd((e_layers, dt_rank, d_inner)),
        b_dt=rnd((e_layers, 1, d_inner), 0.01),
        A_log_T=a_log_t,
        D=jnp.ones((e_layers, 1, d_inner), jnp.float32),
        w_out=rnd((e_layers, d_inner, d_model)),
    )
    return dict(
        layers=layers,
        norm_w=jnp.ones((1, d_model), jnp.float32),
        W_ol=rnd((d_model, c_out)),
        W_tok=rnd((3, enc_in, d_model)),
        W_time=rnd((d_mark, d_model)),
    )


# -----------------------------------------------------------------------------
if __name__ == "__main__":
    # configs (small, consistent with the module)
    B, seq_len, pred_len = 2, 16, 8
    enc_in = c_out = 4
    d_model, expand, d_conv, d_ff, e_layers = 32, 2, 4, 8, 2
    d_mark = 4                          # 'timeF', freq='h'
    d_inner = d_model * expand          # 64
    dt_rank = math.ceil(d_model / 16)   # 2
    n = d_ff                            # SSM state size
    c_out_pad = _round_up(c_out, 128)   # lane-dense output store

    key = jax.random.PRNGKey(0)
    k_in, k_mark, k_par = jax.random.split(key, 3)
    x_enc = jax.random.normal(k_in, (B, seq_len, enc_in), jnp.float32)
    x_mark_enc = jax.random.normal(k_mark, (B, seq_len, d_mark), jnp.float32)

    raw = init_params(k_par, enc_in=enc_in, d_model=d_model, d_inner=d_inner,
                      dt_rank=dt_rank, n=n, d_conv=d_conv, c_out=c_out,
                      d_mark=d_mark, e_layers=e_layers)
    params = dict(W_tok=raw["W_tok"], W_time=raw["W_time"],
                  kernel=pack_params(raw, c_out_pad))

    fwd = jax.jit(partial(model_forward, pred_len=pred_len, d_model=d_model,
                          c_out=c_out))
    out = fwd(x_enc, x_mark_enc, params)
    jax.block_until_ready(out)

    assert out.shape == (B, pred_len, c_out), out.shape
    assert bool(jnp.all(jnp.isfinite(out)))

    # validate against the f32 reference (bf16 MXU weights => loose tolerance)
    ref = model_forward_ref(x_enc, x_mark_enc, raw, pred_len, d_model)
    max_diff = float(jnp.max(jnp.abs(out - ref)))
    assert max_diff < 5e-2, f"max |kernel - ref| = {max_diff}"

    print("KERNEL_OK")
</pallas_src>

<mosaic_0001>
module attributes {stable_mosaic.version = 11 : i64} {
  func.func @_mamba_stack_kernel(%arg0: i32, %arg1: i32, %arg2: memref<1x16x32xf32, #tpu.memory_space<vmem>>, %arg3: memref<1x1x32xf32, #tpu.memory_space<vmem>>, %arg4: memref<1x32x128xbf16, #tpu.memory_space<vmem>>, %arg5: memref<1x4x64xf32, #tpu.memory_space<vmem>>, %arg6: memref<1x64x80xbf16, #tpu.memory_space<vmem>>, %arg7: memref<1x3x64xf32, #tpu.memory_space<vmem>>, %arg8: memref<1x8x64xf32, #tpu.memory_space<vmem>>, %arg9: memref<1x64x32xbf16, #tpu.memory_space<vmem>>, %arg10: memref<1x32xf32, #tpu.memory_space<vmem>>, %arg11: memref<32x128xbf16, #tpu.memory_space<vmem>>, %arg12: memref<1x16x128xf32, #tpu.memory_space<vmem>>, %arg13: memref<16x32xf32, #tpu.memory_space<vmem>>) attributes {dimension_semantics = [#tpu.dimension_semantics<parallel>, #tpu.dimension_semantics<arbitrary>], iteration_bounds = array<i64: 2, 2>, scalar_prefetch = 0 : i64, scratch_operands = 1 : i64, tpu.core_type = #tpu.core_type<tc>, window_params = [{transform_indices = @transform_0, window_bounds = array<i64: 1, 16, 32>}, {transform_indices = @transform_1, window_bounds = array<i64: 1, 1, 32>}, {transform_indices = @transform_2, window_bounds = array<i64: 1, 32, 128>}, {transform_indices = @transform_3, window_bounds = array<i64: 1, 4, 64>}, {transform_indices = @transform_4, window_bounds = array<i64: 1, 64, 80>}, {transform_indices = @transform_5, window_bounds = array<i64: 1, 3, 64>}, {transform_indices = @transform_6, window_bounds = array<i64: 1, 8, 64>}, {transform_indices = @transform_7, window_bounds = array<i64: 1, 64, 32>}, {pipeline_mode = #tpu.pipeline_mode<synchronous>, transform_indices = @transform_8, window_bounds = array<i64: 1, 32>}, {pipeline_mode = #tpu.pipeline_mode<synchronous>, transform_indices = @transform_9, window_bounds = array<i64: 32, 128>}, {transform_indices = @transform_10, window_bounds = array<i64: 1, 16, 128>}]} {
    %c0_i32 = arith.constant 0 : i32
    %0 = arith.cmpi eq, %arg1, %c0_i32 : i32
    %1 = arith.extui %0 : i1 to i32
    %c0_i32_0 = arith.constant 0 : i32
    %2 = arith.cmpi ne, %1, %c0_i32_0 : i32
    scf.if %2 {
      %c0_56 = arith.constant 0 : index
      %c0_57 = arith.constant 0 : index
      %c0_58 = arith.constant 0 : index
      %311 = vector.load %arg2[%c0_56, %c0_57, %c0_58] : memref<1x16x32xf32, #tpu.memory_space<vmem>>, vector<1x16x32xf32>
      %312 = vector.shape_cast %311 : vector<1x16x32xf32> to vector<16x32xf32>
      %c0_59 = arith.constant 0 : index
      %c0_60 = arith.constant 0 : index
      %313 = vector.load %arg13[%c0_59, %c0_60] : memref<16x32xf32, #tpu.memory_space<vmem>>, vector<16x32xf32>
      tpu.vector_store %arg13[%c0_59, %c0_60], %312 {strides = array<i32>} : memref<16x32xf32, #tpu.memory_space<vmem>>, vector<16x32xf32>,
    } else {
    }
    %c0 = arith.constant 0 : index
    %c0_1 = arith.constant 0 : index
    %3 = vector.load %arg13[%c0, %c0_1] : memref<16x32xf32, #tpu.memory_space<vmem>>, vector<16x32xf32>
    %4 = arith.mulf %3, %3 : vector<16x32xf32>
    %cst = arith.constant dense<0.000000e+00> : vector<16xf32>
    %5 = vector.multi_reduction <add>, %4, %cst [1] : vector<16x32xf32> to vector<16xf32>
    %6 = vector.shape_cast %5 : vector<16xf32> to vector<16x1xf32>
    %cst_2 = arith.constant 3.200000e+01 : f32
    %7 = vector.broadcast %cst_2 : f32 to vector<16x1xf32>
    %8 = arith.divf %6, %7 : vector<16x1xf32>
    %cst_3 = arith.constant 9.99999974E-6 : f32
    %9 = vector.broadcast %cst_3 : f32 to vector<16x1xf32>
    %10 = arith.addf %8, %9 : vector<16x1xf32>
    %11 = math.rsqrt %10 : vector<16x1xf32>
    %12 = vector.broadcast %11 : vector<16x1xf32> to vector<16x32xf32>
    %13 = arith.mulf %3, %12 : vector<16x32xf32>
    %c0_4 = arith.constant 0 : index
    %c0_5 = arith.constant 0 : index
    %c0_6 = arith.constant 0 : index
    %14 = vector.load %arg3[%c0_4, %c0_5, %c0_6] : memref<1x1x32xf32, #tpu.memory_space<vmem>>, vector<1x1x32xf32>
    %15 = vector.shape_cast %14 : vector<1x1x32xf32> to vector<1x32xf32>
    %16 = vector.broadcast %15 : vector<1x32xf32> to vector<16x32xf32>
    %17 = arith.mulf %13, %16 : vector<16x32xf32>
    %18 = arith.truncf %17 : vector<16x32xf32> to vector<16x32xbf16>
    %c0_7 = arith.constant 0 : index
    %c0_8 = arith.constant 0 : index
    %c0_9 = arith.constant 0 : index
    %19 = vector.load %arg4[%c0_7, %c0_8, %c0_9] : memref<1x32x128xbf16, #tpu.memory_space<vmem>>, vector<1x32x128xbf16>
    %20 = vector.shape_cast %19 : vector<1x32x128xbf16> to vector<32x128xbf16>
    %cst_10 = arith.constant dense<0.000000e+00> : vector<16x128xf32>
    %21 = tpu.matmul %18, %20, %cst_10 {dimension_numbers = #tpu.dot_dimension_numbers<[1], [0], [0], [1], [0, 0, 1, 1], [], []>} : vector<16x32xbf16>, vector<32x128xbf16>, vector<16x128xf32> -> vector<16x128xf32>
    %22 = vector.extract_strided_slice %21 {offsets = [0, 0], sizes = [16, 64], strides = [1, 1]} : vector<16x128xf32> to vector<16x64xf32>
    %23 = vector.extract_strided_slice %21 {offsets = [0, 64], sizes = [16, 64], strides = [1, 1]} : vector<16x128xf32> to vector<16x64xf32>
    %c0_11 = arith.constant 0 : index
    %c0_12 = arith.constant 0 : index
    %c0_13 = arith.constant 0 : index
    %24 = vector.load %arg5[%c0_11, %c0_12, %c0_13] : memref<1x4x64xf32, #tpu.memory_space<vmem>>, vector<1x4x64xf32>
    %25 = vector.shape_cast %24 : vector<1x4x64xf32> to vector<4x64xf32>
    %c0_14 = arith.constant 0 : index
    %c0_15 = arith.constant 0 : index
    %c0_16 = arith.constant 0 : index
    %26 = vector.load %arg7[%c0_14, %c0_15, %c0_16] : memref<1x3x64xf32, #tpu.memory_space<vmem>>, vector<1x3x64xf32>
    %27 = vector.shape_cast %26 : vector<1x3x64xf32> to vector<3x64xf32>
    %28 = vector.extract_strided_slice %27 {offsets = [0, 0], sizes = [1, 64], strides = [1, 1]} : vector<3x64xf32> to vector<1x64xf32>
    %29 = vector.extract_strided_slice %27 {offsets = [1, 0], sizes = [1, 64], strides = [1, 1]} : vector<3x64xf32> to vector<1x64xf32>
    %30 = vector.extract_strided_slice %27 {offsets = [2, 0], sizes = [1, 64], strides = [1, 1]} : vector<3x64xf32> to vector<1x64xf32>
    %31 = vector.extract_strided_slice %25 {offsets = [3, 0], sizes = [1, 64], strides = [1, 1]} : vector<4x64xf32> to vector<1x64xf32>
    %32 = vector.broadcast %31 : vector<1x64xf32> to vector<16x64xf32>
    %33 = arith.mulf %22, %32 : vector<16x64xf32>
    %34 = vector.broadcast %28 : vector<1x64xf32> to vector<16x64xf32>
    %35 = arith.addf %34, %33 : vector<16x64xf32>
    %cst_17 = arith.constant 0.000000e+00 : f32
    %36 = vector.broadcast %cst_17 : f32 to vector<3x64xf32>
    %37 = vector.extract_strided_slice %22 {offsets = [0, 0], sizes = [13, 64], strides = [1, 1]} : vector<16x64xf32> to vector<13x64xf32>
    %38 = tpu.concatenate %36, %37 in 0 : vector<3x64xf32>, vector<13x64xf32> -> vector<16x64xf32>
    %39 = vector.extract_strided_slice %25 {offsets = [0, 0], sizes = [1, 64], strides = [1, 1]} : vector<4x64xf32> to vector<1x64xf32>
    %40 = vector.broadcast %39 : vector<1x64xf32> to vector<16x64xf32>
    %41 = arith.mulf %38, %40 : vector<16x64xf32>
    %42 = arith.addf %35, %41 : vector<16x64xf32>
    %cst_18 = arith.constant 0.000000e+00 : f32
    %43 = vector.broadcast %cst_18 : f32 to vector<2x64xf32>
    %44 = vector.extract_strided_slice %22 {offsets = [0, 0], sizes = [14, 64], strides = [1, 1]} : vector<16x64xf32> to vector<14x64xf32>
    %45 = tpu.concatenate %43, %44 in 0 : vector<2x64xf32>, vector<14x64xf32> -> vector<16x64xf32>
    %46 = vector.extract_strided_slice %25 {offsets = [1, 0], sizes = [1, 64], strides = [1, 1]} : vector<4x64xf32> to vector<1x64xf32>
    %47 = vector.broadcast %46 : vector<1x64xf32> to vector<16x64xf32>
    %48 = arith.mulf %45, %47 : vector<16x64xf32>
    %49 = arith.addf %42, %48 : vector<16x64xf32>
    %cst_19 = arith.constant 0.000000e+00 : f32
    %50 = vector.broadcast %cst_19 : f32 to vector<1x64xf32>
    %51 = vector.extract_strided_slice %22 {offsets = [0, 0], sizes = [15, 64], strides = [1, 1]} : vector<16x64xf32> to vector<15x64xf32>
    %52 = tpu.concatenate %50, %51 in 0 : vector<1x64xf32>, vector<15x64xf32> -> vector<16x64xf32>
    %53 = vector.extract_strided_slice %25 {offsets = [2, 0], sizes = [1, 64], strides = [1, 1]} : vector<4x64xf32> to vector<1x64xf32>
    %54 = vector.broadcast %53 : vector<1x64xf32> to vector<16x64xf32>
    %55 = arith.mulf %52, %54 : vector<16x64xf32>
    %56 = arith.addf %49, %55 : vector<16x64xf32>
    %57 = arith.negf %56 : vector<16x64xf32>
    %58 = math.exp %57 : vector<16x64xf32>
    %cst_20 = arith.constant 1.000000e+00 : f32
    %59 = vector.broadcast %cst_20 : f32 to vector<16x64xf32>
    %60 = arith.addf %59, %58 : vector<16x64xf32>
    %61 = arith.divf %59, %60 : vector<16x64xf32>
    %62 = arith.mulf %56, %61 : vector<16x64xf32>
    %63 = arith.truncf %62 : vector<16x64xf32> to vector<16x64xbf16>
    %c0_21 = arith.constant 0 : index
    %c0_22 = arith.constant 0 : index
    %c0_23 = arith.constant 0 : index
    %64 = vector.load %arg6[%c0_21, %c0_22, %c0_23] : memref<1x64x80xbf16, #tpu.memory_space<vmem>>, vector<1x64x80xbf16>
    %65 = vector.shape_cast %64 : vector<1x64x80xbf16> to vector<64x80xbf16>
    %cst_24 = arith.constant dense<0.000000e+00> : vector<16x80xf32>
    %66 = tpu.matmul %63, %65, %cst_24 {dimension_numbers = #tpu.dot_dimension_numbers<[1], [0], [0], [1], [0, 0, 1, 1], [], []>} : vector<16x64xbf16>, vector<64x80xbf16>, vector<16x80xf32> -> vector<16x80xf32>
    %67 = vector.extract_strided_slice %66 {offsets = [0, 0], sizes = [16, 64], strides = [1, 1]} : vector<16x80xf32> to vector<16x64xf32>
    %68 = vector.broadcast %29 : vector<1x64xf32> to vector<16x64xf32>
    %69 = arith.addf %67, %68 : vector<16x64xf32>
    %70 = vector.extract_strided_slice %66 {offsets = [0, 64], sizes = [16, 8], strides = [1, 1]} : vector<16x80xf32> to vector<16x8xf32>
    %71 = vector.extract_strided_slice %66 {offsets = [0, 72], sizes = [16, 8], strides = [1, 1]} : vector<16x80xf32> to vector<16x8xf32>
    %72 = math.absf %69 : vector<16x64xf32>
    %cst_25 = arith.constant 0.000000e+00 : f32
    %73 = vector.broadcast %cst_25 : f32 to vector<16x64xf32>
    %74 = arith.subf %73, %72 : vector<16x64xf32>
    %75 = math.exp %74 : vector<16x64xf32>
    %76 = math.log1p %75 : vector<16x64xf32>
    %cst_26 = arith.constant 0.000000e+00 : f32
    %77 = vector.broadcast %cst_26 : f32 to vector<16x64xf32>
    %78 = arith.maximumf %69, %77 : vector<16x64xf32>
    %79 = arith.addf %76, %78 : vector<16x64xf32>
    %80 = arith.mulf %79, %62 : vector<16x64xf32>
    %c0_27 = arith.constant 0 : index
    %c0_28 = arith.constant 0 : index
    %c0_29 = arith.constant 0 : index
    %81 = vector.load %arg8[%c0_27, %c0_28, %c0_29] : memref<1x8x64xf32, #tpu.memory_space<vmem>>, vector<1x8x64xf32>
    %82 = vector.shape_cast %81 : vector<1x8x64xf32> to vector<8x64xf32>
    %83 = math.exp %82 : vector<8x64xf32>
    %cst_30 = arith.constant 0.000000e+00 : f32
    %84 = vector.broadcast %cst_30 : f32 to vector<8x64xf32>
    %85 = arith.subf %84, %83 : vector<8x64xf32>
    %cst_31 = arith.constant 0.000000e+00 : f32
    %86 = vector.broadcast %cst_31 : f32 to vector<8x64xf32>
    %87 = vector.shape_cast %79 : vector<16x64xf32> to vector<16x1x64xf32>
    %88 = vector.shape_cast %85 : vector<8x64xf32> to vector<1x8x64xf32>
    %89 = vector.broadcast %87 : vector<16x1x64xf32> to vector<16x8x64xf32>
    %90 = vector.broadcast %88 : vector<1x8x64xf32> to vector<16x8x64xf32>
    %91 = arith.mulf %89, %90 : vector<16x8x64xf32>
    %92 = math.exp %91 : vector<16x8x64xf32>
    %93 = vector.shape_cast %80 : vector<16x64xf32> to vector<16x1x64xf32>
    %94 = vector.shape_cast %70 : vector<16x8xf32> to vector<16x8x1xf32>
    %95 = vector.broadcast %93 : vector<16x1x64xf32> to vector<16x8x64xf32>
    %96 = vector.broadcast %94 : vector<16x8x1xf32> to vector<16x8x64xf32>
    %97 = arith.mulf %95, %96 : vector<16x8x64xf32>
    %98 = vector.shape_cast %71 : vector<16x8xf32> to vector<16x8x1xf32>
    %99 = vector.extract_strided_slice %92 {offsets = [0, 0, 0], sizes = [1, 8, 64], strides = [1, 1, 1]} : vector<16x8x64xf32> to vector<1x8x64xf32>
    %100 = vector.shape_cast %99 : vector<1x8x64xf32> to vector<8x64xf32>
    %101 = arith.mulf %100, %86 : vector<8x64xf32>
    %102 = vector.extract_strided_slice %97 {offsets = [0, 0, 0], sizes = [1, 8, 64], strides = [1, 1, 1]} : vector<16x8x64xf32> to vector<1x8x64xf32>
    %103 = vector.shape_cast %102 : vector<1x8x64xf32> to vector<8x64xf32>
    %104 = arith.addf %101, %103 : vector<8x64xf32>
    %105 = vector.extract_strided_slice %98 {offsets = [0, 0, 0], sizes = [1, 8, 1], strides = [1, 1, 1]} : vector<16x8x1xf32> to vector<1x8x1xf32>
    %106 = vector.shape_cast %105 : vector<1x8x1xf32> to vector<8x1xf32>
    %107 = vector.broadcast %106 : vector<8x1xf32> to vector<8x64xf32>
    %108 = arith.mulf %104, %107 : vector<8x64xf32>
    %cst_32 = arith.constant dense<0.000000e+00> : vector<64xf32>
    %109 = vector.multi_reduction <add>, %108, %cst_32 [0] : vector<8x64xf32> to vector<64xf32>
    %110 = vector.shape_cast %109 : vector<64xf32> to vector<1x64xf32>
    %111 = vector.extract_strided_slice %92 {offsets = [1, 0, 0], sizes = [1, 8, 64], strides = [1, 1, 1]} : vector<16x8x64xf32> to vector<1x8x64xf32>
    %112 = vector.shape_cast %111 : vector<1x8x64xf32> to vector<8x64xf32>
    %113 = arith.mulf %112, %104 : vector<8x64xf32>
    %114 = vector.extract_strided_slice %97 {offsets = [1, 0, 0], sizes = [1, 8, 64], strides = [1, 1, 1]} : vector<16x8x64xf32> to vector<1x8x64xf32>
    %115 = vector.shape_cast %114 : vector<1x8x64xf32> to vector<8x64xf32>
    %116 = arith.addf %113, %115 : vector<8x64xf32>
    %117 = vector.extract_strided_slice %98 {offsets = [1, 0, 0], sizes = [1, 8, 1], strides = [1, 1, 1]} : vector<16x8x1xf32> to vector<1x8x1xf32>
    %118 = vector.shape_cast %117 : vector<1x8x1xf32> to vector<8x1xf32>
    %119 = vector.broadcast %118 : vector<8x1xf32> to vector<8x64xf32>
    %120 = arith.mulf %116, %119 : vector<8x64xf32>
    %cst_33 = arith.constant dense<0.000000e+00> : vector<64xf32>
    %121 = vector.multi_reduction <add>, %120, %cst_33 [0] : vector<8x64xf32> to vector<64xf32>
    %122 = vector.shape_cast %121 : vector<64xf32> to vector<1x64xf32>
    %123 = vector.extract_strided_slice %92 {offsets = [2, 0, 0], sizes = [1, 8, 64], strides = [1, 1, 1]} : vector<16x8x64xf32> to vector<1x8x64xf32>
    %124 = vector.shape_cast %123 : vector<1x8x64xf32> to vector<8x64xf32>
    %125 = arith.mulf %124, %116 : vector<8x64xf32>
    %126 = vector.extract_strided_slice %97 {offsets = [2, 0, 0], sizes = [1, 8, 64], strides = [1, 1, 1]} : vector<16x8x64xf32> to vector<1x8x64xf32>
    %127 = vector.shape_cast %126 : vector<1x8x64xf32> to vector<8x64xf32>
    %128 = arith.addf %125, %127 : vector<8x64xf32>
    %129 = vector.extract_strided_slice %98 {offsets = [2, 0, 0], sizes = [1, 8, 1], strides = [1, 1, 1]} : vector<16x8x1xf32> to vector<1x8x1xf32>
    %130 = vector.shape_cast %129 : vector<1x8x1xf32> to vector<8x1xf32>
    %131 = vector.broadcast %130 : vector<8x1xf32> to vector<8x64xf32>
    %132 = arith.mulf %128, %131 : vector<8x64xf32>
    %cst_34 = arith.constant dense<0.000000e+00> : vector<64xf32>
    %133 = vector.multi_reduction <add>, %132, %cst_34 [0] : vector<8x64xf32> to vector<64xf32>
    %134 = vector.shape_cast %133 : vector<64xf32> to vector<1x64xf32>
    %135 = vector.extract_strided_slice %92 {offsets = [3, 0, 0], sizes = [1, 8, 64], strides = [1, 1, 1]} : vector<16x8x64xf32> to vector<1x8x64xf32>
    %136 = vector.shape_cast %135 : vector<1x8x64xf32> to vector<8x64xf32>
    %137 = arith.mulf %136, %128 : vector<8x64xf32>
    %138 = vector.extract_strided_slice %97 {offsets = [3, 0, 0], sizes = [1, 8, 64], strides = [1, 1, 1]} : vector<16x8x64xf32> to vector<1x8x64xf32>
    %139 = vector.shape_cast %138 : vector<1x8x64xf32> to vector<8x64xf32>
    %140 = arith.addf %137, %139 : vector<8x64xf32>
    %141 = vector.extract_strided_slice %98 {offsets = [3, 0, 0], sizes = [1, 8, 1], strides = [1, 1, 1]} : vector<16x8x1xf32> to vector<1x8x1xf32>
    %142 = vector.shape_cast %141 : vector<1x8x1xf32> to vector<8x1xf32>
    %143 = vector.broadcast %142 : vector<8x1xf32> to vector<8x64xf32>
    %144 = arith.mulf %140, %143 : vector<8x64xf32>
    %cst_35 = arith.constant dense<0.000000e+00> : vector<64xf32>
    %145 = vector.multi_reduction <add>, %144, %cst_35 [0] : vector<8x64xf32> to vector<64xf32>
    %146 = vector.shape_cast %145 : vector<64xf32> to vector<1x64xf32>
    %147 = vector.extract_strided_slice %92 {offsets = [4, 0, 0], sizes = [1, 8, 64], strides = [1, 1, 1]} : vector<16x8x64xf32> to vector<1x8x64xf32>
    %148 = vector.shape_cast %147 : vector<1x8x64xf32> to vector<8x64xf32>
    %149 = arith.mulf %148, %140 : vector<8x64xf32>
    %150 = vector.extract_strided_slice %97 {offsets = [4, 0, 0], sizes = [1, 8, 64], strides = [1, 1, 1]} : vector<16x8x64xf32> to vector<1x8x64xf32>
    %151 = vector.shape_cast %150 : vector<1x8x64xf32> to vector<8x64xf32>
    %152 = arith.addf %149, %151 : vector<8x64xf32>
    %153 = vector.extract_strided_slice %98 {offsets = [4, 0, 0], sizes = [1, 8, 1], strides = [1, 1, 1]} : vector<16x8x1xf32> to vector<1x8x1xf32>
    %154 = vector.shape_cast %153 : vector<1x8x1xf32> to vector<8x1xf32>
    %155 = vector.broadcast %154 : vector<8x1xf32> to vector<8x64xf32>
    %156 = arith.mulf %152, %155 : vector<8x64xf32>
    %cst_36 = arith.constant dense<0.000000e+00> : vector<64xf32>
    %157 = vector.multi_reduction <add>, %156, %cst_36 [0] : vector<8x64xf32> to vector<64xf32>
    %158 = vector.shape_cast %157 : vector<64xf32> to vector<1x64xf32>
    %159 = vector.extract_strided_slice %92 {offsets = [5, 0, 0], sizes = [1, 8, 64], strides = [1, 1, 1]} : vector<16x8x64xf32> to vector<1x8x64xf32>
    %160 = vector.shape_cast %159 : vector<1x8x64xf32> to vector<8x64xf32>
    %161 = arith.mulf %160, %152 : vector<8x64xf32>
    %162 = vector.extract_strided_slice %97 {offsets = [5, 0, 0], sizes = [1, 8, 64], strides = [1, 1, 1]} : vector<16x8x64xf32> to vector<1x8x64xf32>
    %163 = vector.shape_cast %162 : vector<1x8x64xf32> to vector<8x64xf32>
    %164 = arith.addf %161, %163 : vector<8x64xf32>
    %165 = vector.extract_strided_slice %98 {offsets = [5, 0, 0], sizes = [1, 8, 1], strides = [1, 1, 1]} : vector<16x8x1xf32> to vector<1x8x1xf32>
    %166 = vector.shape_cast %165 : vector<1x8x1xf32> to vector<8x1xf32>
    %167 = vector.broadcast %166 : vector<8x1xf32> to vector<8x64xf32>
    %168 = arith.mulf %164, %167 : vector<8x64xf32>
    %cst_37 = arith.constant dense<0.000000e+00> : vector<64xf32>
    %169 = vector.multi_reduction <add>, %168, %cst_37 [0] : vector<8x64xf32> to vector<64xf32>
    %170 = vector.shape_cast %169 : vector<64xf32> to vector<1x64xf32>
    %171 = vector.extract_strided_slice %92 {offsets = [6, 0, 0], sizes = [1, 8, 64], strides = [1, 1, 1]} : vector<16x8x64xf32> to vector<1x8x64xf32>
    %172 = vector.shape_cast %171 : vector<1x8x64xf32> to vector<8x64xf32>
    %173 = arith.mulf %172, %164 : vector<8x64xf32>
    %174 = vector.extract_strided_slice %97 {offsets = [6, 0, 0], sizes = [1, 8, 64], strides = [1, 1, 1]} : vector<16x8x64xf32> to vector<1x8x64xf32>
    %175 = vector.shape_cast %174 : vector<1x8x64xf32> to vector<8x64xf32>
    %176 = arith.addf %173, %175 : vector<8x64xf32>
    %177 = vector.extract_strided_slice %98 {offsets = [6, 0, 0], sizes = [1, 8, 1], strides = [1, 1, 1]} : vector<16x8x1xf32> to vector<1x8x1xf32>
    %178 = vector.shape_cast %177 : vector<1x8x1xf32> to vector<8x1xf32>
    %179 = vector.broadcast %178 : vector<8x1xf32> to vector<8x64xf32>
    %180 = arith.mulf %176, %179 : vector<8x64xf32>
    %cst_38 = arith.constant dense<0.000000e+00> : vector<64xf32>
    %181 = vector.multi_reduction <add>, %180, %cst_38 [0] : vector<8x64xf32> to vector<64xf32>
    %182 = vector.shape_cast %181 : vector<64xf32> to vector<1x64xf32>
    %183 = vector.extract_strided_slice %92 {offsets = [7, 0, 0], sizes = [1, 8, 64], strides = [1, 1, 1]} : vector<16x8x64xf32> to vector<1x8x64xf32>
    %184 = vector.shape_cast %183 : vector<1x8x64xf32> to vector<8x64xf32>
    %185 = arith.mulf %184, %176 : vector<8x64xf32>
    %186 = vector.extract_strided_slice %97 {offsets = [7, 0, 0], sizes = [1, 8, 64], strides = [1, 1, 1]} : vector<16x8x64xf32> to vector<1x8x64xf32>
    %187 = vector.shape_cast %186 : vector<1x8x64xf32> to vector<8x64xf32>
    %188 = arith.addf %185, %187 : vector<8x64xf32>
    %189 = vector.extract_strided_slice %98 {offsets = [7, 0, 0], sizes = [1, 8, 1], strides = [1, 1, 1]} : vector<16x8x1xf32> to vector<1x8x1xf32>
    %190 = vector.shape_cast %189 : vector<1x8x1xf32> to vector<8x1xf32>
    %191 = vector.broadcast %190 : vector<8x1xf32> to vector<8x64xf32>
    %192 = arith.mulf %188, %191 : vector<8x64xf32>
    %cst_39 = arith.constant dense<0.000000e+00> : vector<64xf32>
    %193 = vector.multi_reduction <add>, %192, %cst_39 [0] : vector<8x64xf32> to vector<64xf32>
    %194 = vector.shape_cast %193 : vector<64xf32> to vector<1x64xf32>
    %195 = vector.extract_strided_slice %92 {offsets = [8, 0, 0], sizes = [1, 8, 64], strides = [1, 1, 1]} : vector<16x8x64xf32> to vector<1x8x64xf32>
    %196 = vector.shape_cast %195 : vector<1x8x64xf32> to vector<8x64xf32>
    %197 = arith.mulf %196, %188 : vector<8x64xf32>
    %198 = vector.extract_strided_slice %97 {offsets = [8, 0, 0], sizes = [1, 8, 64], strides = [1, 1, 1]} : vector<16x8x64xf32> to vector<1x8x64xf32>
    %199 = vector.shape_cast %198 : vector<1x8x64xf32> to vector<8x64xf32>
    %200 = arith.addf %197, %199 : vector<8x64xf32>
    %201 = vector.extract_strided_slice %98 {offsets = [8, 0, 0], sizes = [1, 8, 1], strides = [1, 1, 1]} : vector<16x8x1xf32> to vector<1x8x1xf32>
    %202 = vector.shape_cast %201 : vector<1x8x1xf32> to vector<8x1xf32>
    %203 = vector.broadcast %202 : vector<8x1xf32> to vector<8x64xf32>
    %204 = arith.mulf %200, %203 : vector<8x64xf32>
    %cst_40 = arith.constant dense<0.000000e+00> : vector<64xf32>
    %205 = vector.multi_reduction <add>, %204, %cst_40 [0] : vector<8x64xf32> to vector<64xf32>
    %206 = vector.shape_cast %205 : vector<64xf32> to vector<1x64xf32>
    %207 = vector.extract_strided_slice %92 {offsets = [9, 0, 0], sizes = [1, 8, 64], strides = [1, 1, 1]} : vector<16x8x64xf32> to vector<1x8x64xf32>
    %208 = vector.shape_cast %207 : vector<1x8x64xf32> to vector<8x64xf32>
    %209 = arith.mulf %208, %200 : vector<8x64xf32>
    %210 = vector.extract_strided_slice %97 {offsets = [9, 0, 0], sizes = [1, 8, 64], strides = [1, 1, 1]} : vector<16x8x64xf32> to vector<1x8x64xf32>
    %211 = vector.shape_cast %210 : vector<1x8x64xf32> to vector<8x64xf32>
    %212 = arith.addf %209, %211 : vector<8x64xf32>
    %213 = vector.extract_strided_slice %98 {offsets = [9, 0, 0], sizes = [1, 8, 1], strides = [1, 1, 1]} : vector<16x8x1xf32> to vector<1x8x1xf32>
    %214 = vector.shape_cast %213 : vector<1x8x1xf32> to vector<8x1xf32>
    %215 = vector.broadcast %214 : vector<8x1xf32> to vector<8x64xf32>
    %216 = arith.mulf %212, %215 : vector<8x64xf32>
    %cst_41 = arith.constant dense<0.000000e+00> : vector<64xf32>
    %217 = vector.multi_reduction <add>, %216, %cst_41 [0] : vector<8x64xf32> to vector<64xf32>
    %218 = vector.shape_cast %217 : vector<64xf32> to vector<1x64xf32>
    %219 = vector.extract_strided_slice %92 {offsets = [10, 0, 0], sizes = [1, 8, 64], strides = [1, 1, 1]} : vector<16x8x64xf32> to vector<1x8x64xf32>
    %220 = vector.shape_cast %219 : vector<1x8x64xf32> to vector<8x64xf32>
    %221 = arith.mulf %220, %212 : vector<8x64xf32>
    %222 = vector.extract_strided_slice %97 {offsets = [10, 0, 0], sizes = [1, 8, 64], strides = [1, 1, 1]} : vector<16x8x64xf32> to vector<1x8x64xf32>
    %223 = vector.shape_cast %222 : vector<1x8x64xf32> to vector<8x64xf32>
    %224 = arith.addf %221, %223 : vector<8x64xf32>
    %225 = vector.extract_strided_slice %98 {offsets = [10, 0, 0], sizes = [1, 8, 1], strides = [1, 1, 1]} : vector<16x8x1xf32> to vector<1x8x1xf32>
    %226 = vector.shape_cast %225 : vector<1x8x1xf32> to vector<8x1xf32>
    %227 = vector.broadcast %226 : vector<8x1xf32> to vector<8x64xf32>
    %228 = arith.mulf %224, %227 : vector<8x64xf32>
    %cst_42 = arith.constant dense<0.000000e+00> : vector<64xf32>
    %229 = vector.multi_reduction <add>, %228, %cst_42 [0] : vector<8x64xf32> to vector<64xf32>
    %230 = vector.shape_cast %229 : vector<64xf32> to vector<1x64xf32>
    %231 = vector.extract_strided_slice %92 {offsets = [11, 0, 0], sizes = [1, 8, 64], strides = [1, 1, 1]} : vector<16x8x64xf32> to vector<1x8x64xf32>
    %232 = vector.shape_cast %231 : vector<1x8x64xf32> to vector<8x64xf32>
    %233 = arith.mulf %232, %224 : vector<8x64xf32>
    %234 = vector.extract_strided_slice %97 {offsets = [11, 0, 0], sizes = [1, 8, 64], strides = [1, 1, 1]} : vector<16x8x64xf32> to vector<1x8x64xf32>
    %235 = vector.shape_cast %234 : vector<1x8x64xf32> to vector<8x64xf32>
    %236 = arith.addf %233, %235 : vector<8x64xf32>
    %237 = vector.extract_strided_slice %98 {offsets = [11, 0, 0], sizes = [1, 8, 1], strides = [1, 1, 1]} : vector<16x8x1xf32> to vector<1x8x1xf32>
    %238 = vector.shape_cast %237 : vector<1x8x1xf32> to vector<8x1xf32>
    %239 = vector.broadcast %238 : vector<8x1xf32> to vector<8x64xf32>
    %240 = arith.mulf %236, %239 : vector<8x64xf32>
    %cst_43 = arith.constant dense<0.000000e+00> : vector<64xf32>
    %241 = vector.multi_reduction <add>, %240, %cst_43 [0] : vector<8x64xf32> to vector<64xf32>
    %242 = vector.shape_cast %241 : vector<64xf32> to vector<1x64xf32>
    %243 = vector.extract_strided_slice %92 {offsets = [12, 0, 0], sizes = [1, 8, 64], strides = [1, 1, 1]} : vector<16x8x64xf32> to vector<1x8x64xf32>
    %244 = vector.shape_cast %243 : vector<1x8x64xf32> to vector<8x64xf32>
    %245 = arith.mulf %244, %236 : vector<8x64xf32>
    %246 = vector.extract_strided_slice %97 {offsets = [12, 0, 0], sizes = [1, 8, 64], strides = [1, 1, 1]} : vector<16x8x64xf32> to vector<1x8x64xf32>
    %247 = vector.shape_cast %246 : vector<1x8x64xf32> to vector<8x64xf32>
    %248 = arith.addf %245, %247 : vector<8x64xf32>
    %249 = vector.extract_strided_slice %98 {offsets = [12, 0, 0], sizes = [1, 8, 1], strides = [1, 1, 1]} : vector<16x8x1xf32> to vector<1x8x1xf32>
    %250 = vector.shape_cast %249 : vector<1x8x1xf32> to vector<8x1xf32>
    %251 = vector.broadcast %250 : vector<8x1xf32> to vector<8x64xf32>
    %252 = arith.mulf %248, %251 : vector<8x64xf32>
    %cst_44 = arith.constant dense<0.000000e+00> : vector<64xf32>
    %253 = vector.multi_reduction <add>, %252, %cst_44 [0] : vector<8x64xf32> to vector<64xf32>
    %254 = vector.shape_cast %253 : vector<64xf32> to vector<1x64xf32>
    %255 = vector.extract_strided_slice %92 {offsets = [13, 0, 0], sizes = [1, 8, 64], strides = [1, 1, 1]} : vector<16x8x64xf32> to vector<1x8x64xf32>
    %256 = vector.shape_cast %255 : vector<1x8x64xf32> to vector<8x64xf32>
    %257 = arith.mulf %256, %248 : vector<8x64xf32>
    %258 = vector.extract_strided_slice %97 {offsets = [13, 0, 0], sizes = [1, 8, 64], strides = [1, 1, 1]} : vector<16x8x64xf32> to vector<1x8x64xf32>
    %259 = vector.shape_cast %258 : vector<1x8x64xf32> to vector<8x64xf32>
    %260 = arith.addf %257, %259 : vector<8x64xf32>
    %261 = vector.extract_strided_slice %98 {offsets = [13, 0, 0], sizes = [1, 8, 1], strides = [1, 1, 1]} : vector<16x8x1xf32> to vector<1x8x1xf32>
    %262 = vector.shape_cast %261 : vector<1x8x1xf32> to vector<8x1xf32>
    %263 = vector.broadcast %262 : vector<8x1xf32> to vector<8x64xf32>
    %264 = arith.mulf %260, %263 : vector<8x64xf32>
    %cst_45 = arith.constant dense<0.000000e+00> : vector<64xf32>
    %265 = vector.multi_reduction <add>, %264, %cst_45 [0] : vector<8x64xf32> to vector<64xf32>
    %266 = vector.shape_cast %265 : vector<64xf32> to vector<1x64xf32>
    %267 = vector.extract_strided_slice %92 {offsets = [14, 0, 0], sizes = [1, 8, 64], strides = [1, 1, 1]} : vector<16x8x64xf32> to vector<1x8x64xf32>
    %268 = vector.shape_cast %267 : vector<1x8x64xf32> to vector<8x64xf32>
    %269 = arith.mulf %268, %260 : vector<8x64xf32>
    %270 = vector.extract_strided_slice %97 {offsets = [14, 0, 0], sizes = [1, 8, 64], strides = [1, 1, 1]} : vector<16x8x64xf32> to vector<1x8x64xf32>
    %271 = vector.shape_cast %270 : vector<1x8x64xf32> to vector<8x64xf32>
    %272 = arith.addf %269, %271 : vector<8x64xf32>
    %273 = vector.extract_strided_slice %98 {offsets = [14, 0, 0], sizes = [1, 8, 1], strides = [1, 1, 1]} : vector<16x8x1xf32> to vector<1x8x1xf32>
    %274 = vector.shape_cast %273 : vector<1x8x1xf32> to vector<8x1xf32>
    %275 = vector.broadcast %274 : vector<8x1xf32> to vector<8x64xf32>
    %276 = arith.mulf %272, %275 : vector<8x64xf32>
    %cst_46 = arith.constant dense<0.000000e+00> : vector<64xf32>
    %277 = vector.multi_reduction <add>, %276, %cst_46 [0] : vector<8x64xf32> to vector<64xf32>
    %278 = vector.shape_cast %277 : vector<64xf32> to vector<1x64xf32>
    %279 = vector.extract_strided_slice %92 {offsets = [15, 0, 0], sizes = [1, 8, 64], strides = [1, 1, 1]} : vector<16x8x64xf32> to vector<1x8x64xf32>
    %280 = vector.shape_cast %279 : vector<1x8x64xf32> to vector<8x64xf32>
    %281 = arith.mulf %280, %272 : vector<8x64xf32>
    %282 = vector.extract_strided_slice %97 {offsets = [15, 0, 0], sizes = [1, 8, 64], strides = [1, 1, 1]} : vector<16x8x64xf32> to vector<1x8x64xf32>
    %283 = vector.shape_cast %282 : vector<1x8x64xf32> to vector<8x64xf32>
    %284 = arith.addf %281, %283 : vector<8x64xf32>
    %285 = vector.extract_strided_slice %98 {offsets = [15, 0, 0], sizes = [1, 8, 1], strides = [1, 1, 1]} : vector<16x8x1xf32> to vector<1x8x1xf32>
    %286 = vector.shape_cast %285 : vector<1x8x1xf32> to vector<8x1xf32>
    %287 = vector.broadcast %286 : vector<8x1xf32> to vector<8x64xf32>
    %288 = arith.mulf %284, %287 : vector<8x64xf32>
    %cst_47 = arith.constant dense<0.000000e+00> : vector<64xf32>
    %289 = vector.multi_reduction <add>, %288, %cst_47 [0] : vector<8x64xf32> to vector<64xf32>
    %290 = vector.shape_cast %289 : vector<64xf32> to vector<1x64xf32>
    %291 = tpu.concatenate %110, %122, %134, %146, %158, %170, %182, %194, %206, %218, %230, %242, %254, %266, %278, %290 in 0 : vector<1x64xf32>, vector<1x64xf32>, vector<1x64xf32>, vector<1x64xf32>, vector<1x64xf32>, vector<1x64xf32>, vector<1x64xf32>, vector<1x64xf32>, vector<1x64xf32>, vector<1x64xf32>, vector<1x64xf32>, vector<1x64xf32>, vector<1x64xf32>, vector<1x64xf32>, vector<1x64xf32>, vector<1x64xf32> -> vector<16x64xf32>
    %292 = vector.broadcast %30 : vector<1x64xf32> to vector<16x64xf32>
    %293 = arith.mulf %62, %292 : vector<16x64xf32>
    %294 = arith.addf %291, %293 : vector<16x64xf32>
    %295 = arith.negf %23 : vector<16x64xf32>
    %296 = math.exp %295 : vector<16x64xf32>
    %cst_48 = arith.constant 1.000000e+00 : f32
    %297 = vector.broadcast %cst_48 : f32 to vector<16x64xf32>
    %298 = arith.addf %297, %296 : vector<16x64xf32>
    %299 = arith.divf %297, %298 : vector<16x64xf32>
    %300 = arith.mulf %23, %299 : vector<16x64xf32>
    %301 = arith.mulf %294, %300 : vector<16x64xf32>
    %302 = arith.truncf %301 : vector<16x64xf32> to vector<16x64xbf16>
    %c0_49 = arith.constant 0 : index
    %c0_50 = arith.constant 0 : index
    %c0_51 = arith.constant 0 : index
    %303 = vector.load %arg9[%c0_49, %c0_50, %c0_51] : memref<1x64x32xbf16, #tpu.memory_space<vmem>>, vector<1x64x32xbf16>
    %304 = vector.shape_cast %303 : vector<1x64x32xbf16> to vector<64x32xbf16>
    %cst_52 = arith.constant dense<0.000000e+00> : vector<16x32xf32>
    %305 = tpu.matmul %302, %304, %cst_52 {dimension_numbers = #tpu.dot_dimension_numbers<[1], [0], [0], [1], [0, 0, 1, 1], [], []>} : vector<16x64xbf16>, vector<64x32xbf16>, vector<16x32xf32> -> vector<16x32xf32>
    %306 = arith.addf %305, %3 : vector<16x32xf32>
    %c0_53 = arith.constant 0 : index
    %c0_54 = arith.constant 0 : index
    %307 = vector.load %arg13[%c0_53, %c0_54] : memref<16x32xf32, #tpu.memory_space<vmem>>, vector<16x32xf32>
    tpu.vector_store %arg13[%c0_53, %c0_54], %306 {strides = array<i32>} : memref<16x32xf32, #tpu.memory_space<vmem>>, vector<16x32xf32>,
    %c1_i32 = arith.constant 1 : i32
    %308 = arith.cmpi eq, %arg1, %c1_i32 : i32
    %309 = arith.extui %308 : i1 to i32
    %c0_i32_55 = arith.constant 0 : i32
    %310 = arith.cmpi ne, %309, %c0_i32_55 : i32
    scf.if %310 {
      %311 = arith.mulf %306, %306 : vector<16x32xf32>
      %cst_56 = arith.constant dense<0.000000e+00> : vector<16xf32>
      %312 = vector.multi_reduction <add>, %311, %cst_56 [1] : vector<16x32xf32> to vector<16xf32>
      %313 = vector.shape_cast %312 : vector<16xf32> to vector<16x1xf32>
      %cst_57 = arith.constant 3.200000e+01 : f32
      %314 = vector.broadcast %cst_57 : f32 to vector<16x1xf32>
      %315 = arith.divf %313, %314 : vector<16x1xf32>
      %cst_58 = arith.constant 9.99999974E-6 : f32
      %316 = vector.broadcast %cst_58 : f32 to vector<16x1xf32>
      %317 = arith.addf %315, %316 : vector<16x1xf32>
      %318 = math.rsqrt %317 : vector<16x1xf32>
      %319 = vector.broadcast %318 : vector<16x1xf32> to vector<16x32xf32>
      %320 = arith.mulf %306, %319 : vector<16x32xf32>
      %c0_59 = arith.constant 0 : index
      %c0_60 = arith.constant 0 : index
      %321 = vector.load %arg10[%c0_59, %c0_60] : memref<1x32xf32, #tpu.memory_space<vmem>>, vector<1x32xf32>
      %322 = vector.broadcast %321 : vector<1x32xf32> to vector<16x32xf32>
      %323 = arith.mulf %320, %322 : vector<16x32xf32>
      %324 = arith.truncf %323 : vector<16x32xf32> to vector<16x32xbf16>
      %c0_61 = arith.constant 0 : index
      %c0_62 = arith.constant 0 : index
      %325 = vector.load %arg11[%c0_61, %c0_62] : memref<32x128xbf16, #tpu.memory_space<vmem>>, vector<32x128xbf16>
      %cst_63 = arith.constant dense<0.000000e+00> : vector<16x128xf32>
      %326 = tpu.matmul %324, %325, %cst_63 {dimension_numbers = #tpu.dot_dimension_numbers<[1], [0], [0], [1], [0, 0, 1, 1], [], []>} : vector<16x32xbf16>, vector<32x128xbf16>, vector<16x128xf32> -> vector<16x128xf32>
      %c0_64 = arith.constant 0 : index
      %c0_65 = arith.constant 0 : index
      %c0_66 = arith.constant 0 : index
      %327 = vector.load %arg12[%c0_64, %c0_65, %c0_66] : memref<1x16x128xf32, #tpu.memory_space<vmem>>, vector<1x16x128xf32>
      %328 = vector.shape_cast %327 : vector<1x16x128xf32> to vector<16x128xf32>
      %329 = vector.shape_cast %326 : vector<16x128xf32> to vector<1x16x128xf32>
      tpu.vector_store %arg12[%c0_64, %c0_65, %c0_66], %329 {strides = array<i32>} : memref<1x16x128xf32, #tpu.memory_space<vmem>>, vector<1x16x128xf32>,
    } else {
    }
    return
  }
  func.func @transform_0(%arg0: i32, %arg1: i32) -> (i32, i32, i32) {
    %c0_i32 = arith.constant 0 : i32
    %c0_i32_0 = arith.constant 0 : i32
    %c0_i32_1 = arith.constant 0 : i32
    return %arg0, %c0_i32, %c0_i32_0 : i32, i32, i32
  }
  func.func @transform_1(%arg0: i32, %arg1: i32) -> (i32, i32, i32) {
    %c0_i32 = arith.constant 0 : i32
    %c0_i32_0 = arith.constant 0 : i32
    %c0_i32_1 = arith.constant 0 : i32
    return %arg1, %c0_i32, %c0_i32_0 : i32, i32, i32
  }
  func.func @transform_2(%arg0: i32, %arg1: i32) -> (i32, i32, i32) {
    %c0_i32 = arith.constant 0 : i32
    %c0_i32_0 = arith.constant 0 : i32
    %c0_i32_1 = arith.constant 0 : i32
    return %arg1, %c0_i32, %c0_i32_0 : i32, i32, i32
  }
  func.func @transform_3(%arg0: i32, %arg1: i32) -> (i32, i32, i32) {
    %c0_i32 = arith.constant 0 : i32
    %c0_i32_0 = arith.constant 0 : i32
    %c0_i32_1 = arith.constant 0 : i32
    return %arg1, %c0_i32, %c0_i32_0 : i32, i32, i32
  }
  func.func @transform_4(%arg0: i32, %arg1: i32) -> (i32, i32, i32) {
    %c0_i32 = arith.constant 0 : i32
    %c0_i32_0 = arith.constant 0 : i32
    %c0_i32_1 = arith.constant 0 : i32
    return %arg1, %c0_i32, %c0_i32_0 : i32, i32, i32
  }
  func.func @transform_5(%arg0: i32, %arg1: i32) -> (i32, i32, i32) {
    %c0_i32 = arith.constant 0 : i32
    %c0_i32_0 = arith.constant 0 : i32
    %c0_i32_1 = arith.constant 0 : i32
    return %arg1, %c0_i32, %c0_i32_0 : i32, i32, i32
  }
  func.func @transform_6(%arg0: i32, %arg1: i32) -> (i32, i32, i32) {
    %c0_i32 = arith.constant 0 : i32
    %c0_i32_0 = arith.constant 0 : i32
    %c0_i32_1 = arith.constant 0 : i32
    return %arg1, %c0_i32, %c0_i32_0 : i32, i32, i32
  }
  func.func @transform_7(%arg0: i32, %arg1: i32) -> (i32, i32, i32) {
    %c0_i32 = arith.constant 0 : i32
    %c0_i32_0 = arith.constant 0 : i32
    %c0_i32_1 = arith.constant 0 : i32
    return %arg1, %c0_i32, %c0_i32_0 : i32, i32, i32
  }
  func.func @transform_8(%arg0: i32, %arg1: i32) -> (i32, i32) {
    %c0_i32 = arith.constant 0 : i32
    %c0_i32_0 = arith.constant 0 : i32
    %c0_i32_1 = arith.constant 0 : i32
    return %c0_i32, %c0_i32_0 : i32, i32
  }
  func.func @transform_9(%arg0: i32, %arg1: i32) -> (i32, i32) {
    %c0_i32 = arith.constant 0 : i32
    %c0_i32_0 = arith.constant 0 : i32
    %c0_i32_1 = arith.constant 0 : i32
    return %c0_i32, %c0_i32_0 : i32, i32
  }
  func.func @transform_10(%arg0: i32, %arg1: i32) -> (i32, i32, i32) {
    %c0_i32 = arith.constant 0 : i32
    %c0_i32_0 = arith.constant 0 : i32
    %c0_i32_1 = arith.constant 0 : i32
    return %arg0, %c0_i32, %c0_i32_0 : i32, i32, i32
  }
}

</mosaic_0001>

<bundles_post_ra>
// kernel: model_forward.1
= control target key start
LH: loop header
LB: loop body
LE: loop exit
PB: predicated region body
PF: predicated region fallthrough
CT: control target
= control target key end

     0   :  { %s2268_s13 = smov 0   ;;  %s2270_s14 = smov 0   ;;  %s2716_s0 = inlined_call_operand.vmem [shape: f32[2,16,32], index: 0, kind: input, shape index: {}]   ;;  %s2717_s1 = inlined_call_operand.vmem [shape: f32[2,1,32], index: 1, kind: input, shape index: {}]   ;;  %s2718_s2 = inlined_call_operand.vmem [shape: bf16[2,32,128], index: 2, kind: input, shape index: {}]   ;;  %s2719_s3 = inlined_call_operand.vmem [shape: f32[2,4,64], index: 3, kind: input, shape index: {}]   ;;  %s2720_s4 = inlined_call_operand.vmem [shape: bf16[2,64,80], index: 4, kind: input, shape index: {}]   ;;  %s2721_s5 = inlined_call_operand.vmem [shape: f32[2,3,64], index: 5, kind: input, shape index: {}]   ;;  %s2722_s6 = inlined_call_operand.vmem [shape: f32[2,8,64], index: 6, kind: input, shape index: {}]   ;;  %s2723_s7 = inlined_call_operand.vmem [shape: bf16[2,64,32], index: 7, kind: input, shape index: {}]   ;;  %s2724_s8 = inlined_call_operand.vmem [shape: f32[1,32], index: 8, kind: input, shape index: {}]   ;;  %s2725_s9 = inlined_call_operand.vmem [shape: bf16[32,128], index: 9, kind: input, shape index: {}]   ;;  %s2726_s10 = inlined_call_operand.vmem [shape: f32[2,16,128], index: 10, kind: output, shape index: {}]  }
   0x1   :  { %2729 = sst [smem:[#allocation7_spill]] %s2716_s0  ;;  %s2272_s15 = smov 0  }
   0x2   :  { %2730 = sst [smem:[#allocation8_spill]] %s2718_s2  ;;  %s2274_s16 = smov 0  }
   0x3   :  { %2731 = sst [smem:[#allocation9_spill]] %s2719_s3  ;;  %s2276_s17 = smov 0  }
   0x4 LB: > { %2732 = sst [smem:[#allocation3_spill]] %s2197_s15  ;;  %s29_s18 = sadd.s32 1, %s2197_s15  ;;  %s2205_s17 = sphi %s2276_s17, %s20_s17   ;;  %s2201_s16 = sphi %s2274_s16, %s2743_s16   ;;  %s2197_s15 = sphi %s2272_s15, %s2742_s15   ;;  %s2193_s14 = sphi %s2270_s14, %s2741_s14   ;;  %s2189_s13 = sphi %s2268_s13, %s2740_s13  }
   0x5   : > { %2733 = sst [smem:[#allocation4_spill]] %s2201_s16  ;;  %s32_s19 = sadd.s32 1, %s2201_s16 }
   0x6   : > { %p30_p0 = scmp.ge.s32.totalorder %s29_s18, 2  ;;  %p1940_p1 = scmp.ge.s32.totalorder %s2205_s17, 1 }
   0x7   : > { %p389_p2 = scmp.lt.s32.totalorder %s2205_s17, 5 }
   0x8   : > { %s2745_s18 = smov (%p30_p0, %s29_s18), 0  ;;  %s2747_s19 = smov (!%p30_p0, %s32_s19), %s2201_s16 }
   0x9   : > { %2734 = sst [smem:[#allocation5_spill]] %s2745_s18  ;;  %p390_p3 = pnand %p1940_p1, %p389_p2 }
   0xa   : > { %p34_p4 = scmp.ge.s32.totalorder %s2747_s19, 2  ;;  %p457_p5 = scmp.lt.s32.totalorder (!%p390_p3), %s2193_s14, 1 }
   0xb   : > { %393 = sbr.rel (%p390_p3) target bundleno = 1424 (0x590), region = 60  ;;  %p462_p6 = scmp.lt.s32.totalorder (!%p390_p3), %s2189_s13, 1 }
   0xc   : > { %s2749_s19 = smov (%p34_p4, %s2747_s19), 0  ;;  %s2736_s0 = sld [smem:[#allocation7_spill]] (!%p390_p3) }
   0xd   : > { %2735 = sst [smem:[#allocation6_spill]] %s2749_s19  ;;  %p1954_p7 = scmp.ne.s32.totalorder (!%p390_p3), %s2189_s13, 0 }
   0xe   : > { %s2737_s2 = sld [smem:[#allocation8_spill]] (!%p390_p3) }
   0xf   : > { %s2738_s3 = sld [smem:[#allocation9_spill]] (!%p390_p3) }
  0x10   : > { %s2751_s14 = smov (!%p457_p5, %s2193_s14), 1 }
  0x11   : > { %s2302_s20 = scalar_select %p462_p6, %s2189_s13, 1 }
  0x12   : > { %s1980_s21 = sshll.u32 %s2751_s14, 4 }
  0x13   : > { %s461_s24 = scalar_lea.vmem %s2736_s0, %s1980_s21  ;;  %s1981_s28 = sshll.u32 %s2302_s20, 4 }
  0x14   : > { %s1945_s29 = sshll.u32 %s2302_s20, 2  ;;  %s2316_s12 = scalar_lea.vmem %s2737_s2, %s1981_s28 }
  0x15   : > { %s2321_s16 = scalar_lea.vmem %s2738_s3, %s1945_s29  ;;  %s1982_s14 = sshll.u32 %s2302_s20, 5 }
  0x16   : > { %s2327_s23 = scalar_lea.vmem %s2721_s5, %s1945_s29  ;;  %s2332_s27 = scalar_lea.vmem %s2720_s4, %s1982_s14 }
  0x17   : > { %s1949_s0 = sshll.u32 %s2302_s20, 3  ;;  %s2343_s2 = scalar_lea.vmem %s2723_s7, %s1982_s14 }
  0x18   : > { %s2338_s11 = scalar_lea.vmem %s2722_s6, %s1949_s0  ;;  %s2348_s29 = scalar_lea.vmem %s2726_s10, %s1980_s21 }
  0x19   : > { %501 = sbr.rel (%p1954_p7) target bundleno = 32 (0x20), region = 64 }
  0x1e   : > { %v502_v0 = vld [vmem:[%s461_s24] sm:$0xff]  ;;  %vm504_vm0 = vcmask 261120   ;;  %v503_v1 = vld [vmem:[%s461_s24 + $0x8] sm:$0xff] }
  0x1f   : > { %505 = vst.msk [vmem:[#allocation2] sm:$0xff] %vm504_vm0, %v502_v0  ;;  %506 = vst.msk [vmem:[#allocation2 + $0x8] sm:$0xff] %vm504_vm0, %v503_v1 }
  0x20 PF: > { %vm511_vm1 = vcmask 261120   ;;  %v2087_v8 = vld [vmem:[%s2316_s12 + $0x8] sm:$0xff]   ;;  %v2207_v9 = vmov 0.0   ;;  %vm2208_vm2 = vmmov 0   ;;  %v2088_v10 = vld [vmem:[%s2316_s12] sm:$0xff]   ;;  %s2739_s21 = scalar_lea.vmem %s2717_s1, %s2302_s20  ;;  %v2089_v25 = vld [vmem:[%s2332_s27 + $0x18] sm:$0xff]   ;;  %v599_v29 = vlaneseq }
  0x21   : > { %2001 = vmatprep.subr.bf16.mxu0 %v2207_v9  ;;  %2005 = vmatprep.mubr.msk.bf16.mxu0 %vm2208_vm2, %v2207_v9  ;;  %v1955_v20 = vld [vmem:[%s2739_s21] ss:$0 sm:$0xff]  ;;  %v2090_v26 = vld [vmem:[%s2332_s27 + $0x10] sm:$0xff]   ;;  %v2091_v27 = vld [vmem:[%s2332_s27 + $0x8] sm:$0xff]   ;;  %vm613_vm3 = vcmask 1042432   ;;  %vm628_vm4 = vcmask 1041408  }
  0x22   : > { %2002 = vmatpush3.bf16.msra.mxu0 %v2087_v8  ;;  %2009 = vmatprep.subr.bf16.mxu1 %v2207_v9  ;;  %v2092_v28 = vld [vmem:[%s2332_s27] sm:$0xff]   ;;  %v2378_v30 = vshrl.u32 %v599_v29, 7  ;;  %vm643_vm5 = vcmask 1040384   ;;  %vm705_vm6 = vcmask 523264   ;;  %vm1571_vm9 = vcmask 1043456   ;;  %p1973_p8 = scmp.ne.s32.totalorder %s2189_s13, 1 }
  0x23   : > { %2003 = vmatprep.subr.bf16.mxu0 %v2207_v9  ;;  %2017 = vmatprep.mubr.msk.bf16.mxu1 %vm2208_vm2, %v2207_v9  ;;  %v597_v32 = vld [vmem:[%s2321_s16] sm:$0xf]  ;;  %s2210_s16 = smov 64   ;;  %vm1575_vm10 = vcmask 1045504   ;;  %vm1573_vm11 = vcmask 1044480   ;;  %vm1577_vm12 = vcmask 1046528  }
  0x24   : > { %2010 = vmatpush3.bf16.msra.mxu1 %v2089_v25  ;;  %v2381_v31 = vsub.s32 3, %v2378_v30  ;;  %v2385_v33 = vsub.s32 0, %v2378_v30  ;;  %v2388_v34 = vld [vmem:[%s2327_s23] sm:$0x7]  ;;  %v2392_v36 = vsub.s32 1, %v2378_v30  ;;  %v2397_v38 = vsub.s32 2, %v2378_v30 }
  0x25   : > { %2011 = vmatprep.subr.bf16.mxu1 %v2207_v9 }
  0x26   : > { %v507_v2 = vld [vmem:[#allocation2] sm:$0xff]  ;;  %v508_v3 = vld [vmem:[#allocation2 + $0x8] sm:$0xff]  ;;  %2004 = vmatpush3.bf16.msra.mxu0 %v2088_v10  ;;  %v602_v35 = vrot.slane %v597_v32, %v2381_v31  ;;  %v608_v37 = vrot.slane %v2388_v34, %v2385_v33  ;;  %v623_v40 = vrot.slane %v597_v32, %v2385_v33  ;;  %v638_v45 = vrot.slane %v597_v32, %v2392_v36 }
  0x27   : > { %v509_v4 = vmul.f32 %v507_v2, %v507_v2  ;;  %v510_v5 = vmul.f32 %v508_v3, %v508_v3  ;;  %2021 = vmatprep.subr.bf16.mxu0 %v2207_v9  ;;  %v653_v52 = vrot.slane %v597_v32, %v2397_v38 }
  0x28   : > { %2012 = vmatpush3.bf16.msra.mxu1 %v2090_v26 }
  0x29   : > { %v512_v6 = vsel %vm511_vm1, %v509_v4, 0.0  ;;  %v515_v7 = vsel %vm511_vm1, %v510_v5, 0.0  ;;  %2013 = vmatprep.subr.bf16.mxu1 %v2207_v9 }
  0x2a   : > { %513 = vadd.xlane.f32.xlu0 %v512_v6 }
  0x2c   : > { %2014 = vmatpush3.bf16.msra.mxu1 %v2091_v27  ;;  %v753_v27 = vrot.slane %v2388_v34, %v2392_v36 }
  0x2d   : > { %2015 = vmatprep.subr.bf16.mxu1 %v2207_v9 }
  0x2e   : > { %516 = vadd.xlane.f32.xlu0 %v515_v7 }
  0x30   : > { %2016 = vmatpush3.bf16.msra.mxu1 %v2092_v28 }
  0xb3   : > { %v514_v11 = vpop.xlane.xlu0 %513 }
  0xb4   : > { %v519_v12 = vmul.f32 0.03125, %v514_v11 }
  0xb6   : > { %v521_v13 = vadd.f32 1e-05, %v519_v12 }
  0xb7   : > { %v517_v14 = vpop.xlane.xlu0 %516 }
  0xb8   : > { %2097 = vrsqrt.f32 %v521_v13  ;;  %v520_v15 = vmul.f32 0.03125, %v517_v14 }
  0xba   : > { %v522_v16 = vadd.f32 1e-05, %v520_v15 }
  0xbc   : > { %2099 = vrsqrt.f32 %v522_v16 }
  0xc5   : > { %v2098_v17 = vpop.eup %2097 }
  0xc6   : > { %v525_v18 = vmul.f32 %v2098_v17, %v507_v2 }
  0xc8   : > { %v534_v22 = vmul.f32 %v1955_v20, %v525_v18 }
  0xc9   : > { %v2100_v19 = vpop.eup %2099 }
  0xca   : > { %v526_v21 = vmul.f32 %v2100_v19, %v508_v3 }
  0xcc   : > { %v535_v23 = vmul.f32 %v1955_v20, %v526_v21 }
  0xce   : > { %v536_v24 = vpack.c.bf16 %v535_v23, %v534_v22 }
  0xd0   : > { %2006 = vmatmul.mubr.msk.bf16.vlgmr.msra.gmra.mxu0 %vm511_vm1, %v536_v24 }
  0xd1   : > { %2029 = vmatprep.mubr.msk.bf16.mxu0 %vm2208_vm2, %v2207_v9 }
 0x190   : > { %v2399_v39 = vpop.f32.mrf.mxu0 }
 0x191   : > { %v603_v41 = vmul.f32 %v602_v35, %v2399_v39  ;;  %v614_v42 = vrot.slane %v2399_v39, 5  ;;  %v629_v43 = vrot.slane %v2399_v39, 6  ;;  %v644_v44 = vrot.slane %v2399_v39, 7 }
 0x192   : > { %v2007_v46 = vpop.f32.mrf.mxu0 }
 0x193   : > { %v609_v47 = vadd.f32 %v608_v37, %v603_v41  ;;  %v619_v48 = vsel %vm613_vm3, 0.0, %v614_v42  ;;  %v634_v49 = vsel %vm628_vm4, 0.0, %v629_v43  ;;  %v649_v51 = vsel %vm643_vm5, 0.0, %v644_v44 }
 0x194   : > { %v624_v50 = vmul.f32 %v623_v40, %v619_v48  ;;  %v2411_v53 = vpop.f32.mrf.mxu0  ;;  %v639_v59 = vmul.f32 %v638_v45, %v634_v49  ;;  %v654_v0 = vmul.f32 %v653_v52, %v649_v51  ;;  %v1170_v49 = vsub.s32 6, %v2378_v30 }
 0x195   : > { %v604_v54 = vmul.f32 %v602_v35, %v2411_v53  ;;  %v615_v55 = vrot.slane %v2411_v53, 5  ;;  %v630_v56 = vrot.slane %v2411_v53, 6  ;;  %v645_v57 = vrot.slane %v2411_v53, 7 }
 0x196   : > { %v626_v58 = vadd.f32 %v624_v50, %v609_v47  ;;  %v2008_v60 = vpop.f32.mrf.mxu0 }
 0x197   : > { %v610_v61 = vadd.f32 %v608_v37, %v604_v54  ;;  %v616_v62 = vsel %vm613_vm3, %v614_v42, %v615_v55  ;;  %v631_v63 = vsel %vm628_vm4, %v629_v43, %v630_v56  ;;  %v646_v3 = vsel %vm643_vm5, %v644_v44, %v645_v57 }
 0x198   : > { %v625_v1 = vmul.f32 %v623_v40, %v616_v62  ;;  %v641_v2 = vadd.f32 %v639_v59, %v626_v58  ;;  %v640_v5 = vmul.f32 %v638_v45, %v631_v63  ;;  %v655_v8 = vmul.f32 %v653_v52, %v646_v3 }
 0x199   : > { %v1154_v37 = vsub.s32 4, %v2378_v30  ;;  %v1967_v42 = vmul.f32 -1.442695, %v2411_v53  ;;  %v1162_v45 = vsub.s32 5, %v2378_v30  ;;  %v1178_v52 = vsub.s32 7, %v2378_v30 }
 0x19a   : > { %v627_v4 = vadd.f32 %v625_v1, %v610_v61  ;;  %v656_v6 = vadd.f32 %v654_v0, %v641_v2  ;;  %v1966_v63 = vmul.f32 -1.442695, %v2399_v39 }
 0x19c   : > { %v642_v7 = vadd.f32 %v640_v5, %v627_v4  ;;  %v1959_v10 = vmul.f32 -1.442695, %v656_v6 }
 0x19e   : > { %v657_v11 = vadd.f32 %v655_v8, %v642_v7  ;;  %2101 = vpow2.f32 %v1959_v10 }
 0x1a0   : > { %v1960_v12 = vmul.f32 -1.442695, %v657_v11 }
 0x1a2   : > { %2103 = vpow2.f32 %v1960_v12 }
 0x1ab   : > { %v2102_v13 = vpop.eup %2101 }
 0x1ac   : > { %v664_v14 = vadd.f32 1.0, %v2102_v13 }
 0x1ae   : > { %2105 = vrcp.f32 %v664_v14 }
 0x1af   : > { %v2104_v15 = vpop.eup %2103 }
 0x1b0   : > { %v665_v16 = vadd.f32 1.0, %v2104_v15 }
 0x1b2   : > { %2107 = vrcp.f32 %v665_v16 }
 0x1bb   : > { %v2106_v17 = vpop.eup %2105 }
 0x1bc   : > { %v2420_v19 = vmul.f32 %v2106_v17, %v656_v6  ;;  %v2209_v17 = vmov 1966171168  }
 0x1bf   : > { %v2108_v18 = vpop.eup %2107 }
 0x1c0   : > { %v2422_v20 = vmul.f32 %v2108_v18, %v657_v11  ;;  %v796_v18 = vunpack.c.l.s4 %v2209_v17 }
 0x1c2   : > { %v672_v21 = vpack.c.bf16 %v2422_v20, %v2420_v19 }
 0x1c4   : > { %2018 = vmatmul.mubr.msk.bf16.vlgmr.msra.gmra.mxu1 %vm705_vm6, %v672_v21 }
 0x284   : > { %v743_v22 = vpop.f32.mrf.mxu1 }
 0x285   : > { %v1139_v23 = vrot.slane %v743_v22, %v2397_v38  ;;  %v1123_v24 = vrot.slane %v743_v22, %v2385_v33  ;;  %v1131_v28 = vrot.slane %v743_v22, %v2392_v36  ;;  %v1147_v35 = vrot.slane %v743_v22, %v2381_v31 }
 0x286   : > { %v2019_v25 = vpop.f32.mrf.mxu1  ;;  %v1155_v43 = vrot.slane %v743_v22, %v1154_v37  ;;  %v1163_v47 = vrot.slane %v743_v22, %v1162_v45  ;;  %v2450_v50 = vadd.f32 %v753_v27, %v743_v22  ;;  %v2458_v55 = vrot.slane %v743_v22, %v1178_v52 }
 0x287   : > { %1142 = vbcast.lane.b32.xlu0 %v1139_v23, 320  ;;  %1126 = vbcast.lane.b32.xlu1 %v1123_v24, 320 }
 0x288   : > { %v2429_v26 = vpop.f32.mrf.mxu1  ;;  %v756_v54 = vand.u32 2147483647, %v2450_v50 }
 0x289   : > { %v2435_v32 = vadd.f32 %v753_v27, %v2429_v26  ;;  %v2443_v44 = vrot.slane %v2429_v26, %v2392_v36  ;;  %v1211_v48 = vrot.slane %v2429_v26, %v2381_v31  ;;  %v2452_v36 = vrot.slane %v743_v22, %v1170_v49 }
 0x28a   : > { %v2020_v29 = vpop.f32.mrf.mxu1  ;;  %v1227_v51 = vrot.slane %v2429_v26, %v1162_v45  ;;  %v1187_v31 = vrot.slane %v2429_v26, %v2385_v33  ;;  %v758_v56 = vsub.f32 0.0, %v756_v54  ;;  %v1243_v58 = vrot.slane %v2429_v26, %v1178_v52 }
 0x28b   : > { %1346 = vbcast.lane.b32.xlu0 %v1123_v24, 328  ;;  %1134 = vbcast.lane.b32.xlu1 %v1131_v28, 320  ;;  %v757_v40 = vand.u32 2147483647, %v2435_v32  ;;  %v1219_v0 = vrot.slane %v2429_v26, %v1154_v37  ;;  %v1235_v3 = vrot.slane %v2429_v26, %v1170_v49  ;;  %v1203_v8 = vrot.slane %v2429_v26, %v2397_v38 }
 0x28c   : > { %v760_v61 = vmul.f32 1.442695, %v758_v56  ;;  %v783_v15 = vmax.f32 %v2435_v32, 0.0  ;;  %v782_v45 = vmax.f32 %v2450_v50, 0.0 }
 0x28d   : > { %v759_v41 = vsub.f32 0.0, %v757_v40 }
 0x28f   : > { %1354 = vbcast.lane.b32.xlu0 %v1139_v23, 328  ;;  %1150 = vbcast.lane.b32.xlu1 %v1147_v35, 320  ;;  %v762_v46 = vmul.f32 1.442695, %v759_v41  ;;  %v797_v23 = vunpack.c.0.s8 %v796_v18 }
 0x291   : > { %2109 = vpow2.f32 %v762_v46 }
 0x292   : > { %2111 = vpow2.f32 %v1967_v42 }
 0x293   : > { %1158 = vbcast.lane.b32.xlu1 %v1155_v43, 320  ;;  %1198 = vbcast.lane.b32.xlu0 %v2443_v44, 320 }
 0x297   : > { %1166 = vbcast.lane.b32.xlu1 %v1163_v47, 320  ;;  %1214 = vbcast.lane.b32.xlu0 %v1211_v48, 320 }
 0x29b   : > { %1174 = vbcast.lane.b32.xlu1 %v2452_v36, 320  ;;  %1230 = vbcast.lane.b32.xlu0 %v1227_v51, 320 }
 0x29e   : > { %v2110_v57 = vpop.eup %2109 }
 0x29f   : > { %1182 = vbcast.lane.b32.xlu1 %v2458_v55, 320  ;;  %1378 = vbcast.lane.b32.xlu0 %v1187_v31, 328  ;;  %v773_v59 = vadd.f32 1.0, %v2110_v57  ;;  %v2112_v60 = vpop.eup %2111  ;;  %v776_v1 = vmul.f32 -0.5, %v2110_v57  ;;  %v779_v5 = vand.u32 2147483647, %v2110_v57 }
 0x2a0   : > { %v1601_v62 = vadd.f32 1.0, %v2112_v60 }
 0x2a1   : > { %2113 = vlog2.f32 %v773_v59  ;;  %v777_v4 = vadd.f32 1.0, %v776_v1  ;;  %vm780_vm7 = vcmp.lt.f32.partialorder %v779_v5, 0.0004427343 }
 0x2a2   : > { %2115 = vpow2.f32 %v760_v61 }
 0x2a3   : > { %1350 = vbcast.lane.b32.xlu1 %v1131_v28, 328  ;;  %1246 = vbcast.lane.b32.xlu0 %v1243_v58, 320  ;;  %2117 = vrcp.f32 %v1601_v62  ;;  %v778_v11 = vmul.f32 %v2110_v57, %v777_v4  ;;  %v788_v28 = vld [vmem:[%s2338_s11] sm:$0xff] }
 0x2a4   : > { %2119 = vpow2.f32 %v1966_v63  ;;  %v2096_v57 = vld [vmem:[%s2343_s2] sm:$0xff]  }
 0x2a7   : > { %1358 = vbcast.lane.b32.xlu1 %v1147_v35, 328  ;;  %1390 = vbcast.lane.b32.xlu0 %v1211_v48, 328 }
 0x2ab   : > { %1362 = vbcast.lane.b32.xlu1 %v1155_v43, 328  ;;  %1394 = vbcast.lane.b32.xlu0 %v1219_v0, 328 }
 0x2ae   : > { %v2114_v2 = vpop.eup %2113 }
 0x2af   : > { %1398 = vbcast.lane.b32.xlu0 %v1227_v51, 328  ;;  %1190 = vbcast.lane.b32.xlu1 %v1187_v31, 320  ;;  %v2116_v6 = vpop.eup %2115  ;;  %v775_v7 = vmul.f32 0.6931472, %v2114_v2  ;;  %v2094_v51 = vld [vmem:[%s2343_s2 + $0x10] sm:$0xff]  }
 0x2b0   : > { %v2118_v10 = vpop.eup %2117  ;;  %v764_v12 = vadd.f32 1.0, %v2116_v6  ;;  %v767_v26 = vmul.f32 -0.5, %v2116_v6  ;;  %v770_v40 = vand.u32 2147483647, %v2116_v6 }
 0x2b1   : > { %v781_v13 = vsel %vm780_vm7, %v778_v11, %v775_v7  ;;  %v1607_v14 = vmul.f32 %v2118_v10, %v2411_v53  ;;  %v2120_v16 = vpop.eup %2119  ;;  %v2479_v53 = vsub.s32 %v797_v23, %v2378_v30  ;;  %v789_v30 = vmul.f32 1.442695, %v788_v28 }
 0x2b2   : > { %2121 = vlog2.f32 %v764_v12  ;;  %v2472_v21 = vadd.f32 %v783_v15, %v781_v13  ;;  %v1600_v22 = vadd.f32 1.0, %v2120_v16  ;;  %v768_v35 = vadd.f32 1.0, %v767_v26 }
 0x2b3   : > { %1402 = vbcast.lane.b32.xlu0 %v1235_v3, 328  ;;  %1366 = vbcast.lane.b32.xlu1 %v1163_v47, 328  ;;  %vm771_vm8 = vcmp.lt.f32.partialorder %v770_v40, 0.0004427343 }
 0x2b4   : > { %v2476_v24 = vmul.f32 %v2472_v21, %v2422_v20  ;;  %2123 = vrcp.f32 %v1600_v22  ;;  %v769_v42 = vmul.f32 %v2116_v6, %v768_v35 }
 0x2b5   : > { %2125 = vpow2.f32 %v789_v30 }
 0x2b6   : > { %v1071_v25 = vcombine.high %v2476_v24, %v2476_v24 }
 0x2b7   : > { %1406 = vbcast.lane.b32.xlu0 %v1243_v58, 328  ;;  %1206 = vbcast.lane.b32.xlu1 %v1203_v8, 320 }
 0x2b8   : > { %v1085_v27 = vrot.slane %v1071_v25, %v2479_v53 }
 0x2ba   : > { %v1087_v29 = vcombine.high %v1085_v27, %v1085_v27  ;;  %v2493_v46 = vrot.slane %v1085_v27, %v2479_v53 }
 0x2bb   : > { %1612 = vrot.lane.b32.xlu0 %v1607_v14, %s2210_s16  ;;  %1222 = vbcast.lane.b32.xlu1 %v1219_v0, 320 }
 0x2bc   : > { %v2487_v37 = vrot.slane %v1087_v29, %v2479_v53 }
 0x2bf   : > { %1238 = vbcast.lane.b32.xlu1 %v1235_v3, 320  ;;  %v2122_v32 = vpop.eup %2121 }
 0x2c0   : > { %v766_v41 = vmul.f32 0.6931472, %v2122_v32 }
 0x2c1   : > { %v2124_v43 = vpop.eup %2123 }
 0x2c2   : > { %v1606_v47 = vmul.f32 %v2124_v43, %v2399_v39  ;;  %v2126_v54 = vpop.eup %2125 }
 0x2c3   : > { %1382 = vbcast.lane.b32.xlu1 %v2443_v44, 328  ;;  %v772_v44 = vsel %vm771_vm8, %v769_v42, %v766_v41  ;;  %v2503_v31 = vsub.f32 0.0, %v2126_v54 }
 0x2c4   : > { %v784_v48 = vadd.f32 %v782_v45, %v772_v44 }
 0x2c6   : > { %v801_v49 = vrot.slane %v784_v48, %v2479_v53  ;;  %v794_v59 = vcombine.high %v784_v48, %v784_v48  ;;  %v786_v3 = vmul.f32 %v784_v48, %v2420_v19 }
 0x2c7   : > { %1386 = vbcast.lane.b32.xlu1 %v1203_v8, 328 }
 0x2c8   : > { %v817_v52 = vrot.slane %v801_v49, %v2479_v53  ;;  %v809_v50 = vcombine.high %v801_v49, %v801_v49  ;;  %v808_v63 = vrot.slane %v794_v59, %v2479_v53  ;;  %v1029_v8 = vrot.slane %v786_v3, %v2479_v53 }
 0x2c9   : > { %v1022_v43 = vcombine.high %v786_v3, %v786_v3 }
 0x2ca   : > { %v895_v39 = vrot.slane %v817_v52, %v2385_v33  ;;  %v831_v56 = vrot.slane %v809_v50, %v2479_v53  ;;  %v839_v60 = vcombine.high %v817_v52, %v817_v52  ;;  %v824_v4 = vrot.slane %v808_v63, %v2479_v53 }
 0x2cb   : > { %1370 = vbcast.lane.b32.xlu1 %v2452_v36, 328  ;;  %v2093_v36 = vld [vmem:[%s2343_s2 + $0x18] sm:$0xff]   ;;  %v810_v7 = vcombine.high %v808_v63, %v808_v63  ;;  %v1045_v14 = vrot.slane %v1029_v8, %v2479_v53  ;;  %v1037_v15 = vcombine.high %v1029_v8, %v1029_v8 }
 0x2cc   : > { %2022 = vmatpush3.bf16.msra.mxu0 %v2093_v36  ;;  %v972_v58 = vmul.f32 %v895_v39, %v2503_v31  ;;  %v899_v61 = vrot.slane %v831_v56, %v2385_v33  ;;  %v841_v0 = vcombine.high %v831_v56, %v831_v56  ;;  %v903_v1 = vrot.slane %v839_v60, %v2385_v33 }
 0x2cd   : > { %2023 = vmatprep.subr.bf16.mxu0 %v2207_v9  ;;  %v911_v10 = vrot.slane %v824_v4, %v2385_v33  ;;  %v838_v13 = vrot.slane %v810_v7, %v2479_v53  ;;  %v840_v22 = vcombine.high %v824_v4, %v824_v4  ;;  %v1059_v25 = vrot.slane %v1037_v15, %v2479_v53 }
 0x2ce   : > { %v988_v62 = vmul.f32 1.442695, %v972_v58  ;;  %v973_v2 = vmul.f32 %v899_v61, %v2503_v31  ;;  %v907_v6 = vrot.slane %v841_v0, %v2385_v33  ;;  %v1251_v27 = vrot.slane %v1045_v14, %v2385_v33 }
 0x2cf   : > { %1374 = vbcast.lane.b32.xlu1 %v2458_v55, 328  ;;  %v2095_v55 = vld [vmem:[%s2343_s2 + $0x8] sm:$0xff]   ;;  %v976_v16 = vmul.f32 %v911_v10, %v2503_v31  ;;  %v915_v18 = vrot.slane %v838_v13, %v2385_v33  ;;  %v919_v29 = vrot.slane %v840_v22, %v2385_v33  ;;  %v1067_v41 = vcombine.high %v1045_v14, %v1045_v14 }
 0x2d0   : > { %2024 = vmatpush3.bf16.msra.mxu0 %v2094_v51  ;;  %2127 = vpow2.f32 %v988_v62  ;;  %v990_v5 = vmul.f32 1.442695, %v973_v2  ;;  %v975_v12 = vmul.f32 %v907_v6, %v2503_v31  ;;  %v1255_v42 = vrot.slane %v1059_v25, %v2385_v33 }
 0x2d1   : > { %2025 = vmatprep.subr.bf16.mxu0 %v2207_v9  ;;  %v996_v26 = vmul.f32 1.442695, %v976_v16  ;;  %v977_v28 = vmul.f32 %v915_v18, %v2503_v31  ;;  %v842_v48 = vcombine.high %v838_v13, %v838_v13  ;;  %v1259_v54 = vrot.slane %v1067_v41, %v2385_v33 }
 0x2d2   : > { %2129 = vpow2.f32 %v990_v5  ;;  %v994_v17 = vmul.f32 1.442695, %v975_v12  ;;  %v1036_v39 = vrot.slane %v1022_v43, %v2479_v53  ;;  %v850_v56 = vrot.slane %v2472_v21, %v2479_v53 }
 0x2d3   : > { %1610 = vrot.lane.b32.xlu1 %v1606_v47, %s2210_s16  ;;  %v998_v45 = vmul.f32 1.442695, %v977_v28  ;;  %v978_v47 = vmul.f32 %v919_v29, %v2503_v31  ;;  %v923_v59 = vrot.slane %v842_v48, %v2385_v33 }
 0x2d4   : > { %2026 = vmatpush3.bf16.msra.mxu0 %v2095_v55  ;;  %v1069_v55 = vcombine.high %v1059_v25, %v1059_v25  ;;  %v858_v2 = vcombine.high %v850_v56, %v850_v56  ;;  %v1038_v3 = vcombine.high %v1036_v39, %v1036_v39 }
 0x2d5   : > { %2027 = vmatprep.subr.bf16.mxu0 %v2207_v9  ;;  %v974_v9 = vmul.f32 %v903_v1, %v2503_v31  ;;  %v1000_v58 = vmul.f32 1.442695, %v978_v47  ;;  %v1052_v1 = vrot.slane %v1036_v39, %v2479_v53  ;;  %v979_v5 = vmul.f32 %v923_v59, %v2503_v31 }
 0x2d6   : > { %v1263_v0 = vrot.slane %v1069_v55, %v2385_v33  ;;  %v1066_v12 = vrot.slane %v1038_v3, %v2479_v53  ;;  %v880_v13 = vrot.slane %v858_v2, %v2479_v53 }
 0x2d7   : > { %v992_v11 = vmul.f32 1.442695, %v974_v9  ;;  %v866_v9 = vrot.slane %v850_v56, %v2479_v53  ;;  %v1267_v16 = vrot.slane %v1052_v1, %v2385_v33 }
 0x2d8   : > { %2028 = vmatpush3.bf16.msra.mxu0 %v2096_v57  ;;  %v1271_v28 = vrot.slane %v1066_v12, %v2385_v33  ;;  %v931_v29 = vrot.slane %v880_v13, %v2385_v33  ;;  %v1070_v3 = vcombine.high %v1066_v12, %v1066_v12 }
 0x2d9   : > { %2131 = vpow2.f32 %v992_v11  ;;  %v927_v18 = vrot.slane %v866_v9, %v2385_v33 }
 0x2da   : > { %2133 = vpow2.f32 %v994_v17  ;;  %v1002_v17 = vmul.f32 1.442695, %v979_v5 }
 0x2db   : > { %2135 = vpow2.f32 %v996_v26 }
 0x2dc   : > { %2137 = vpow2.f32 %v998_v45  ;;  %v1068_v45 = vcombine.high %v1052_v1, %v1052_v1  ;;  %v1078_v1 = vrot.slane %v2476_v24, %v2479_v53 }
 0x2dd   : > { %v2128_v23 = vpop.eup %2127  ;;  %2139 = vpow2.f32 %v1000_v58 }
 0x2de   : > { %v1408_v30 = vmul.f32 0.0, %v2128_v23  ;;  %2141 = vpow2.f32 %v1002_v17  ;;  %v1275_v39 = vrot.slane %v1068_v45, %v2385_v33  ;;  %v1086_v12 = vcombine.high %v1078_v1, %v1078_v1 }
 0x2df   : > { %v2130_v49 = vpop.eup %2129  ;;  %v1279_v17 = vrot.slane %v1070_v3, %v2385_v33 }
 0x2e6   : > { %v2132_v60 = vpop.eup %2131 }
 0x2e7   : > { %v2134_v6 = vpop.eup %2133 }
 0x2e8   : > { %v2136_v14 = vpop.eup %2135 }
 0x2f9   : > { %v1143_v32 = vpop.permute.xlu0 %1142  ;;  %v1127_v35 = vpop.permute.xlu1 %1126 }
 0x2fa   : > { %v1328_v40 = vmul.f32 %v1251_v27, %v1127_v35  ;;  %v1330_v62 = vmul.f32 %v1259_v54, %v1143_v32  ;;  %v843_v27 = vcombine.high %v2472_v21, %v2472_v21  ;;  %v980_v35 = vmul.f32 %v927_v18, %v2503_v31 }
 0x2fb   : > { %v981_v21 = vmul.f32 %v931_v29, %v2503_v31 }
 0x2fc   : > { %v2531_v44 = vadd.f32 %v1408_v30, %v1328_v40  ;;  %v888_v40 = vcombine.high %v866_v9, %v866_v9  ;;  %v2138_v30 = vpop.eup %2137  ;;  %v857_v47 = vrot.slane %v843_v27, %v2479_v53 }
 0x2fd   : > { %v1135_v36 = vpop.permute.xlu1 %1134  ;;  %v2536_v50 = vpop.permute.xlu0 %1346  ;;  %v1006_v59 = vmul.f32 1.442695, %v981_v21 }
 0x2fe   : > { %v1329_v51 = vmul.f32 %v1255_v42, %v1135_v36  ;;  %v1418_v52 = vmul.f32 %v2130_v49, %v2531_v44  ;;  %v1004_v49 = vmul.f32 1.442695, %v980_v35  ;;  %v890_v36 = vcombine.high %v880_v13, %v880_v13 }
 0x2ff   : > { %v859_v58 = vcombine.high %v857_v47, %v857_v47  ;;  %v1108_v35 = vrot.slane %v1086_v12, %v2479_v53 }
 0x300   : > { %v2541_v57 = vadd.f32 %v1418_v52, %v1329_v51  ;;  %v935_v51 = vrot.slane %v888_v40, %v2385_v33  ;;  %v2140_v52 = vpop.eup %2139  ;;  %2143 = vpow2.f32 %v1004_v49 }
 0x301   : > { %v1151_v61 = vpop.permute.xlu1 %1150  ;;  %v1355_v7 = vpop.permute.xlu0 %1354  ;;  %v887_v5 = vrot.slane %v859_v58, %v2479_v53  ;;  %2145 = vpow2.f32 %v1006_v59 }
 0x302   : > { %v1428_v63 = vmul.f32 %v2132_v60, %v2541_v57  ;;  %v1331_v10 = vmul.f32 %v1263_v0, %v1151_v61  ;;  %v873_v60 = vrot.slane %v857_v47, %v2479_v53  ;;  %v2142_v13 = vpop.eup %2141 }
 0x304   : > { %v2547_v4 = vadd.f32 %v1428_v63, %v1330_v62  ;;  %v939_v62 = vrot.slane %v890_v36, %v2385_v33  ;;  %v982_v63 = vmul.f32 %v935_v51, %v2503_v31 }
 0x305   : > { %v1159_v8 = vpop.permute.xlu1 %1158  ;;  %v2559_v26 = vpop.permute.xlu0 %1198 }
 0x306   : > { %v1438_v11 = vmul.f32 %v2134_v6, %v2547_v4  ;;  %v1332_v23 = vmul.f32 %v1267_v16, %v1159_v8  ;;  %v943_v6 = vrot.slane %v873_v60, %v2385_v33  ;;  %v1430_v16 = vmul.f32 %v2547_v4, %v1355_v7 }
 0x308   : > { %v2554_v15 = vadd.f32 %v1438_v11, %v1331_v10  ;;  %v983_v10 = vmul.f32 %v939_v62, %v2503_v31  ;;  %v1008_v11 = vmul.f32 1.442695, %v982_v63  ;;  %v1431_v29 = vsel %vm705_vm6, %v1430_v16, 0.0 }
 0x309   : > { %v1167_v22 = vpop.permute.xlu1 %1166  ;;  %v2574_v54 = vpop.permute.xlu0 %1214  ;;  %v1432_v51 = vrot.slane %v1431_v29, 4 }
 0x30a   : > { %v1448_v25 = vmul.f32 %v2136_v14, %v2554_v15  ;;  %v1333_v42 = vmul.f32 %v1271_v28, %v1167_v22  ;;  %v1410_v14 = vmul.f32 %v2531_v44, %v2536_v50  ;;  %v1094_v22 = vrot.slane %v1078_v1, %v2479_v53 }
 0x30b   : > { %2147 = vpow2.f32 %v1008_v11  ;;  %v1010_v44 = vmul.f32 1.442695, %v983_v10  ;;  %v1433_v3 = vadd.f32 %v1432_v51, %v1431_v29  ;;  %v1118_v11 = vcombine.high %v1108_v35, %v1108_v35 }
 0x30c   : > { %v2565_v32 = vadd.f32 %v1448_v25, %v1332_v23  ;;  %v984_v23 = vmul.f32 %v943_v6, %v2503_v31  ;;  %v889_v25 = vcombine.high %v873_v60, %v873_v60  ;;  %v1411_v50 = vsel %vm705_vm6, %v1410_v14, 0.0 }
 0x30d   : > { %v1175_v41 = vpop.permute.xlu1 %1174  ;;  %v2585_v9 = vpop.permute.xlu0 %1230  ;;  %v1412_v47 = vrot.slane %v1411_v50, 4  ;;  %2149 = vpow2.f32 %v1010_v44  ;;  %v1116_v60 = vcombine.high %v1094_v22, %v1094_v22 }
 0x30e   : > { %v1458_v43 = vmul.f32 %v2138_v30, %v2565_v32  ;;  %v1334_v61 = vmul.f32 %v1275_v39, %v1175_v41  ;;  %v951_v45 = vrot.slane %v889_v25, %v2385_v33  ;;  %v1012_v49 = vmul.f32 1.442695, %v984_v23  ;;  %v2144_v36 = vpop.eup %2143 }
 0x30f   : > { %v1413_v63 = vadd.f32 %v1412_v47, %v1411_v50  ;;  %v2146_v1 = vpop.eup %2145  ;;  %v1434_v23 = vrot.slane %v1433_v3, 2 }
 0x310   : > { %v2571_v48 = vadd.f32 %v1458_v43, %v1333_v42  ;;  %v1283_v42 = vrot.slane %v1094_v22, %v2385_v33  ;;  %v891_v43 = vcombine.high %v887_v5, %v887_v5  ;;  %v986_v62 = vmul.f32 %v951_v45, %v2503_v31 }
 0x311   : > { %v1183_v55 = vpop.permute.xlu1 %1182  ;;  %v1379_v4 = vpop.permute.xlu0 %1378  ;;  %2151 = vpow2.f32 %v1012_v49  ;;  %v1119_v49 = vcombine.high %v2487_v37, %v2487_v37 }
 0x312   : > { %v1468_v56 = vmul.f32 %v2140_v52, %v2571_v48  ;;  %v1335_v27 = vmul.f32 %v1279_v17, %v1183_v55  ;;  %v1287_v55 = vrot.slane %v1108_v35, %v2385_v33  ;;  %v1016_v12 = vmul.f32 1.442695, %v986_v62 }
 0x313   : > { %v1414_v17 = vrot.slane %v1413_v63, 2 }
 0x314   : > { %v2583_v2 = vadd.f32 %v1468_v56, %v1334_v61  ;;  %v955_v61 = vrot.slane %v891_v43, %v2385_v33  ;;  %v1337_v10 = vmul.f32 %v1287_v55, %v2559_v26  ;;  %v1295_v26 = vrot.slane %v1118_v11, %v2385_v33 }
 0x315   : > { %v1351_v0 = vpop.permute.xlu1 %1350  ;;  %v2613_v59 = vpop.permute.xlu0 %1246  ;;  %v1415_v35 = vadd.f32 %v1414_v17, %v1413_v63  ;;  %v1435_v43 = vadd.f32 %v1434_v23, %v1433_v3  ;;  %v1117_v55 = vcombine.high %v2493_v46, %v2493_v46  ;;  %v2638_v63 = vrot.slane %v2388_v34, %v2397_v38 }
 0x316   : > { %v1420_v8 = vmul.f32 %v2541_v57, %v1351_v0  ;;  %v1478_v18 = vmul.f32 %v2142_v13, %v2583_v2  ;;  %v947_v57 = vrot.slane %v887_v5, %v2385_v33  ;;  %v987_v16 = vmul.f32 %v955_v61, %v2503_v31 }
 0x318   : > { %v1421_v28 = vsel %vm705_vm6, %v1420_v8, 0.0  ;;  %v2603_v40 = vadd.f32 %v1478_v18, %v1335_v27  ;;  %v985_v21 = vmul.f32 %v947_v57, %v2503_v31  ;;  %v2148_v57 = vpop.eup %2147  ;;  %v1018_v29 = vmul.f32 1.442695, %v987_v16 }
 0x319   : > { %v1359_v24 = vpop.permute.xlu1 %1358  ;;  %v1422_v41 = vrot.slane %v1421_v28, 4  ;;  %v1391_v27 = vpop.permute.xlu0 %1390 }
 0x31a   : > { %v1440_v30 = vmul.f32 %v2554_v15, %v1359_v24  ;;  %v1488_v56 = vmul.f32 %v2144_v36, %v2603_v40  ;;  %v1291_v24 = vrot.slane %v1116_v60, %v2385_v33  ;;  %v1436_v60 = vrot.slane %v1435_v43, 1 }
 0x31b   : > { %v1423_v58 = vadd.f32 %v1422_v41, %v1421_v28 }
 0x31c   : > { %v1441_v15 = vsel %vm705_vm6, %v1440_v30, 0.0 }
 0x31d   : > { %v1363_v7 = vpop.permute.xlu1 %1362  ;;  %v1442_v5 = vrot.slane %v1441_v15, 4  ;;  %v1424_v14 = vrot.slane %v1423_v58, 2 }
 0x31e   : > { %v1450_v52 = vmul.f32 %v2565_v32, %v1363_v7  ;;  %v1014_v32 = vmul.f32 1.442695, %v985_v21  ;;  %v1339_v21 = vmul.f32 %v1295_v26, %v2574_v54 }
 0x31f   : > { %v1443_v25 = vadd.f32 %v1442_v5, %v1441_v15  ;;  %v1425_v7 = vadd.f32 %v1424_v14, %v1423_v58  ;;  %v1416_v15 = vrot.slane %v1415_v35, 1  ;;  %v1311_v5 = vrot.slane %v1119_v49, %v2385_v33 }
 0x320   : > { %v1451_v6 = vsel %vm705_vm6, %v1450_v52, 0.0  ;;  %2153 = vpow2.f32 %v1014_v32 }
 0x321   : > { %v1191_v53 = vpop.permute.xlu1 %1190  ;;  %v1452_v18 = vrot.slane %v1451_v6, 4  ;;  %2155 = vpow2.f32 %v1016_v12  ;;  %v1444_v45 = vrot.slane %v1443_v25, 2  ;;  %v1426_v52 = vrot.slane %v1425_v7, 1 }
 0x322   : > { %v1336_v39 = vmul.f32 %v1283_v42, %v1191_v53  ;;  %v2150_v42 = vpop.eup %2149  ;;  %v1395_v53 = vpop.permute.xlu0 %1394  ;;  %2157 = vpow2.f32 %v1018_v29 }
 0x323   : > { %v1453_v30 = vadd.f32 %v1452_v18, %v1451_v6  ;;  %v2152_v58 = vpop.eup %2151  ;;  %v1445_v61 = vadd.f32 %v1444_v45, %v1443_v25  ;;  %v1427_v3 = vadd.f32 %v1426_v52, %v1425_v7  ;;  %v2645_v18 = vadd.f32 %v1436_v60, %v1435_v43 }
 0x324   : > { %v1489_v0 = vadd.f32 %v1488_v56, %v1336_v39 }
 0x325   : > { %v1367_v8 = vpop.permute.xlu1 %1366  ;;  %v1454_v39 = vrot.slane %v1453_v30, 2  ;;  %v1446_v38 = vrot.slane %v1445_v61, 1 }
 0x326   : > { %v1498_v13 = vmul.f32 %v2146_v1, %v1489_v0  ;;  %v1490_v31 = vmul.f32 %v1489_v0, %v1379_v4  ;;  %v1460_v36 = vmul.f32 %v2571_v48, %v1367_v8  ;;  %v1299_v4 = vrot.slane %v2493_v46, %v2385_v33 }
 0x327   : > { %v1303_v48 = vrot.slane %v2487_v37, %v2385_v33  ;;  %v1307_v8 = vrot.slane %v1117_v55, %v2385_v33  ;;  %v1455_v11 = vadd.f32 %v1454_v39, %v1453_v30 }
 0x328   : > { %v1499_v22 = vadd.f32 %v1498_v13, %v1337_v10  ;;  %v1491_v54 = vsel %vm705_vm6, %v1490_v31, 0.0  ;;  %v1461_v0 = vsel %vm705_vm6, %v1460_v36, 0.0  ;;  %v1417_v10 = vadd.f32 %v1416_v15, %v1415_v35 }
 0x329   : > { %v1207_v28 = vpop.permute.xlu1 %1206  ;;  %v1492_v6 = vrot.slane %v1491_v54, 4  ;;  %v1341_v34 = vmul.f32 %v1303_v48, %v2585_v9  ;;  %v1462_v16 = vrot.slane %v1461_v0, 4  ;;  %v1456_v26 = vrot.slane %v1455_v11, 1 }
 0x32a   : > { %v1338_v44 = vmul.f32 %v1291_v24, %v1207_v28  ;;  %v1508_v50 = vmul.f32 %v2148_v57, %v1499_v22  ;;  %v1399_v24 = vpop.permute.xlu0 %1398  ;;  %v2648_v33 = vsel %vm643_vm5, %v1417_v10, %v1427_v3  ;;  %v2653_v35 = vadd.f32 %v1446_v38, %v1445_v61 }
 0x32b   : > { %v1493_v28 = vadd.f32 %v1492_v6, %v1491_v54  ;;  %v1463_v30 = vadd.f32 %v1462_v16, %v1461_v0 }
 0x32c   : > { %v2622_v41 = vadd.f32 %v1508_v50, %v1338_v44 }
 0x32d   : > { %v1223_v47 = vpop.permute.xlu1 %1222  ;;  %v2154_v14 = vpop.eup %2153  ;;  %v1464_v54 = vrot.slane %v1463_v30, 2 }
 0x32e   : > { %v1518_v51 = vmul.f32 %v2150_v42, %v2622_v41  ;;  %v1340_v32 = vmul.f32 %v1299_v4, %v1223_v47  ;;  %v2156_v50 = vpop.eup %2155  ;;  %v1403_v49 = vpop.permute.xlu0 %1402  ;;  %v2656_v4 = vadd.f32 %v1456_v26, %v1455_v11 }
 0x330   : > { %v1519_v56 = vadd.f32 %v1518_v51, %v1339_v21  ;;  %v1494_v21 = vrot.slane %v1493_v28, 2 }
 0x331   : > { %v1239_v62 = vpop.permute.xlu1 %1238 }
 0x332   : > { %v1520_v46 = vmul.f32 %v1519_v56, %v1391_v27  ;;  %v1528_v1 = vmul.f32 %v2152_v58, %v1519_v56  ;;  %v1343_v27 = vmul.f32 %v1311_v5, %v2613_v59  ;;  %v1342_v43 = vmul.f32 %v1307_v8, %v1239_v62  ;;  %v1407_v11 = vpop.permute.xlu0 %1406 }
 0x334   : > { %v1521_v37 = vsel %vm705_vm6, %v1520_v46, 0.0  ;;  %v1529_v13 = vadd.f32 %v1528_v1, %v1340_v32  ;;  %v1495_v32 = vadd.f32 %v1494_v21, %v1493_v28 }
 0x335   : > { %v1522_v12 = vrot.slane %v1521_v37, 4  ;;  %v1383_v17 = vpop.permute.xlu1 %1382 }
 0x336   : > { %v1530_v57 = vmul.f32 %v1529_v13, %v1395_v53  ;;  %v1538_v23 = vmul.f32 %v2154_v14, %v1529_v13  ;;  %v1500_v25 = vmul.f32 %v1499_v22, %v1383_v17  ;;  %v2158_v53 = vpop.eup %2157  ;;  %v1496_v17 = vrot.slane %v1495_v32, 1 }
 0x337   : > { %v1523_v44 = vadd.f32 %v1522_v12, %v1521_v37 }
 0x338   : > { %v1531_v9 = vsel %vm705_vm6, %v1530_v57, 0.0  ;;  %v1539_v7 = vadd.f32 %v1538_v23, %v1341_v34  ;;  %v1501_v29 = vsel %vm705_vm6, %v1500_v25, 0.0  ;;  %v1465_v57 = vadd.f32 %v1464_v54, %v1463_v30 }
 0x339   : > { %v1532_v31 = vrot.slane %v1531_v9, 4  ;;  %v1502_v42 = vrot.slane %v1501_v29, 4  ;;  %v1387_v22 = vpop.permute.xlu1 %1386  ;;  %v1524_v36 = vrot.slane %v1523_v44, 2 }
 0x33a   : > { %v1540_v45 = vmul.f32 %v1539_v7, %v1399_v24  ;;  %v1548_v47 = vmul.f32 %v2156_v50, %v1539_v7  ;;  %v1510_v59 = vmul.f32 %v2622_v41, %v1387_v22 }
 0x33b   : > { %v1533_v51 = vadd.f32 %v1532_v31, %v1531_v9  ;;  %v1503_v52 = vadd.f32 %v1502_v42, %v1501_v29  ;;  %v1525_v46 = vadd.f32 %v1524_v36, %v1523_v44 }
 0x33c   : > { %v1541_v55 = vsel %vm705_vm6, %v1540_v45, 0.0  ;;  %v1549_v15 = vadd.f32 %v1548_v47, %v1342_v43  ;;  %v1511_v39 = vsel %vm705_vm6, %v1510_v59, 0.0  ;;  %v1497_v43 = vadd.f32 %v1496_v17, %v1495_v32 }
 0x33d   : > { %v1534_v56 = vrot.slane %v1533_v51, 2  ;;  %v1542_v58 = vrot.slane %v1541_v55, 4  ;;  %v1504_v60 = vrot.slane %v1503_v52, 2  ;;  %v1371_v48 = vpop.permute.xlu1 %1370  ;;  %v1512_v62 = vrot.slane %v1511_v39, 4 }
 0x33e   : > { %v1550_v61 = vmul.f32 %v1549_v15, %v1403_v49  ;;  %v1558_v41 = vmul.f32 %v2158_v53, %v1549_v15  ;;  %v1470_v0 = vmul.f32 %v2583_v2, %v1371_v48  ;;  %v1526_v26 = vrot.slane %v1525_v46, 1 }
 0x33f   : > { %v1543_v1 = vadd.f32 %v1542_v58, %v1541_v55  ;;  %v1505_v3 = vadd.f32 %v1504_v60, %v1503_v52  ;;  %v1513_v8 = vadd.f32 %v1512_v62, %v1511_v39  ;;  %v1535_v37 = vadd.f32 %v1534_v56, %v1533_v51 }
 0x340   : > { %v1551_v5 = vsel %vm705_vm6, %v1550_v61, 0.0  ;;  %v1559_v6 = vadd.f32 %v1558_v41, %v1343_v27  ;;  %v1471_v10 = vsel %vm705_vm6, %v1470_v0, 0.0  ;;  %v1466_v59 = vrot.slane %v1465_v57, 1 }
 0x341   : > { %v1544_v13 = vrot.slane %v1543_v1, 2  ;;  %v1552_v14 = vrot.slane %v1551_v5, 4  ;;  %v1506_v34 = vrot.slane %v1505_v3, 1  ;;  %v1375_v38 = vpop.permute.xlu1 %1374  ;;  %v1514_v16 = vrot.slane %v1513_v8, 2 }
 0x342   : > { %v1560_v24 = vmul.f32 %v1559_v6, %v1407_v11  ;;  %v1472_v12 = vrot.slane %v1471_v10, 4  ;;  %v1480_v2 = vmul.f32 %v2603_v40, %v1375_v38  ;;  %v1536_v31 = vrot.slane %v1535_v37, 1 }
 0x343   : > { %v1545_v23 = vadd.f32 %v1544_v13, %v1543_v1  ;;  %v1553_v25 = vadd.f32 %v1552_v14, %v1551_v5  ;;  %v1515_v28 = vadd.f32 %v1514_v16, %v1513_v8  ;;  %v1507_v29 = vadd.f32 %v1506_v34, %v1505_v3 }
 0x344   : > { %v1561_v27 = vsel %vm705_vm6, %v1560_v24, 0.0  ;;  %v1473_v44 = vadd.f32 %v1472_v12, %v1471_v10  ;;  %v1481_v50 = vsel %vm705_vm6, %v1480_v2, 0.0  ;;  %v1527_v51 = vadd.f32 %v1526_v26, %v1525_v46  ;;  %v1613_v24 = vpop.permute.xlu0 %1612 }
 0x345   : > { %v1554_v9 = vrot.slane %v1553_v25, 2  ;;  %v1562_v7 = vrot.slane %v1561_v27, 4  ;;  %v1516_v42 = vrot.slane %v1515_v28, 1  ;;  %v1482_v40 = vrot.slane %v1481_v50, 4  ;;  %v1611_v12 = vpop.permute.xlu1 %1610 }
 0x346   : > { %v1474_v22 = vrot.slane %v1473_v44, 2  ;;  %v1546_v30 = vrot.slane %v1545_v23, 1  ;;  %v1579_v55 = vsel %vm643_vm5, %v1497_v43, %v1507_v29  ;;  %v1537_v15 = vadd.f32 %v1536_v31, %v1535_v37 }
 0x347   : > { %v1555_v45 = vadd.f32 %v1554_v9, %v1553_v25  ;;  %v1563_v47 = vadd.f32 %v1562_v7, %v1561_v27  ;;  %v1517_v21 = vadd.f32 %v1516_v42, %v1515_v28  ;;  %v1483_v36 = vadd.f32 %v1482_v40, %v1481_v50  ;;  %v2160_v28 = vld [vmem:[#allocation2 + $0x8] sm:$0xff] }
 0x348   : > { %v1475_v49 = vadd.f32 %v1474_v22, %v1473_v44  ;;  %v1547_v58 = vadd.f32 %v1546_v30, %v1545_v23  ;;  %v1467_v41 = vadd.f32 %v1466_v59, %v1465_v57  ;;  %v1569_v32 = vsel %vm628_vm4, %v2648_v33, %v2645_v18  ;;  %v2159_v23 = vld [vmem:[#allocation2] sm:$0xff] }
 0x349   : > { %v1556_v52 = vrot.slane %v1555_v45, 1  ;;  %v1564_v53 = vrot.slane %v1563_v47, 2  ;;  %v1580_v39 = vsel %vm628_vm4, %v1579_v55, %v1517_v21  ;;  %v1484_v56 = vrot.slane %v1483_v36, 2 }
 0x34a   : > { %v1476_v54 = vrot.slane %v1475_v49, 1  ;;  %v1581_v61 = vsel %vm613_vm3, %v1580_v39, %v1527_v51  ;;  %v1570_v5 = vsel %vm613_vm3, %v1569_v32, %v2653_v35  ;;  %v1591_v14 = vmul.f32 %v2638_v63, %v2422_v20 }
 0x34b   : > { %v1557_v60 = vadd.f32 %v1556_v52, %v1555_v45  ;;  %v1565_v48 = vadd.f32 %v1564_v53, %v1563_v47  ;;  %v1485_v62 = vadd.f32 %v1484_v56, %v1483_v36  ;;  %v1582_v0 = vsel %vm1571_vm9, %v1581_v61, %v1537_v15 }
 0x34c   : > { %v1477_v46 = vadd.f32 %v1476_v54, %v1475_v49  ;;  %v1583_v3 = vsel %vm1573_vm11, %v1582_v0, %v1547_v58  ;;  %v1572_v10 = vsel %vm1571_vm9, %v1570_v5, %v2656_v4  ;;  %v1590_v33 = vmul.f32 %v2638_v63, %v2420_v19 }
 0x34d   : > { %v1566_v1 = vrot.slane %v1565_v48, 1  ;;  %v1486_v6 = vrot.slane %v1485_v62, 1  ;;  %v1584_v8 = vsel %vm1575_vm10, %v1583_v3, %v1557_v60  ;;  %v1574_v13 = vsel %vm1573_vm11, %v1572_v10, %v1467_v41 }
 0x34e   : > { %v1576_v18 = vsel %vm1575_vm10, %v1574_v13, %v1477_v46 }
 0x34f   : > { %v1567_v11 = vadd.f32 %v1566_v1, %v1565_v48  ;;  %v1487_v37 = vadd.f32 %v1486_v6, %v1485_v62 }
 0x351   : > { %v1585_v34 = vsel %vm1577_vm12, %v1584_v8, %v1567_v11  ;;  %v1578_v35 = vsel %vm1577_vm12, %v1576_v18, %v1487_v37 }
 0x352   : > { %v1593_v38 = vadd.f32 %v1591_v14, %v1585_v34  ;;  %v1592_v16 = vadd.f32 %v1590_v33, %v1578_v35 }
 0x354   : > { %v1617_v2 = vmul.f32 %v1613_v24, %v1593_v38  ;;  %v1616_v17 = vmul.f32 %v1611_v12, %v1592_v16 }
 0x356   : > { %v1618_v4 = vpack.c.bf16 %v1617_v2, %v1616_v17 }
 0x358   : > { %2030 = vmatmul.mubr.msk.bf16.vlgmr.msra.gmra.mxu0 %vm705_vm6, %v1618_v4 }
 0x418   : > { %v1688_v57 = vpop.f32.mrf.mxu0 }
 0x419   : > { %v1689_v25 = vadd.f32 %v2159_v23, %v1688_v57 }
 0x41a   : > { %v2031_v20 = vpop.f32.mrf.mxu0 }
 0x41b   : > { %1695 = vst.msk [vmem:[#allocation2] sm:$0xff] %vm511_vm1, %v1689_v25  ;;  %1700 = sbr.rel (%p1973_p8) target bundleno = 1424 (0x590), region = 68 }
 0x41c   : > { %v1691_v27 = vpop.f32.mrf.mxu0 }
 0x41d   : > { %v1692_v19 = vadd.f32 %v2160_v28, %v1691_v27 }
 0x41e   : > { %v2032_v63 = vpop.f32.mrf.mxu0 }
 0x41f   : > { %1696 = vst.msk [vmem:[#allocation2 + $0x8] sm:$0xff] %vm511_vm1, %v1692_v19 }
 0x420   : > { %v1701_v44 = vmul.f32 %v1689_v25, %v1689_v25  ;;  %v1702_v50 = vmul.f32 %v1692_v19, %v1692_v19  ;;  %v2161_v7 = vld [vmem:[%s2725_s9 + $0x8] sm:$0xff]   ;;  %v2211_v29 = vmov 0.0   ;;  %v2162_v31 = vld [vmem:[%s2725_s9] sm:$0xff]   ;;  %vm2212_vm13 = vmmov 0  }
 0x421   : > { %2033 = vmatprep.subr.bf16.mxu0 %v2211_v29  ;;  %2037 = vmatprep.mubr.msk.bf16.mxu0 %vm2212_vm13, %v2211_v29  ;;  %v1974_v49 = vld [vmem:[%s2724_s8] ss:$0 sm:$0xff] }
 0x422   : > { %v1703_v26 = vsel %vm511_vm1, %v1701_v44, 0.0  ;;  %v1706_v9 = vsel %vm511_vm1, %v1702_v50, 0.0  ;;  %2034 = vmatpush3.bf16.msra.mxu0 %v2161_v7 }
 0x423   : > { %1704 = vadd.xlane.f32.xlu0 %v1703_v26  ;;  %2035 = vmatprep.subr.bf16.mxu0 %v2211_v29 }
 0x426   : > { %2036 = vmatpush3.bf16.msra.mxu0 %v2162_v31 }
 0x427   : > { %1707 = vadd.xlane.f32.xlu0 %v1706_v9 }
 0x4ac   : > { %v1705_v42 = vpop.xlane.xlu0 %1704 }
 0x4ad   : > { %v1709_v22 = vmul.f32 0.03125, %v1705_v42 }
 0x4af   : > { %v1711_v40 = vadd.f32 1e-05, %v1709_v22 }
 0x4b0   : > { %v1708_v43 = vpop.xlane.xlu0 %1707 }
 0x4b1   : > { %2163 = vrsqrt.f32 %v1711_v40  ;;  %v1710_v30 = vmul.f32 0.03125, %v1708_v43 }
 0x4b3   : > { %v1712_v45 = vadd.f32 1e-05, %v1710_v30 }
 0x4b5   : > { %2165 = vrsqrt.f32 %v1712_v45 }
 0x4be   : > { %v2164_v47 = vpop.eup %2163 }
 0x4bf   : > { %v1715_v59 = vmul.f32 %v2164_v47, %v1689_v25 }
 0x4c1   : > { %v1724_v51 = vmul.f32 %v1974_v49, %v1715_v59 }
 0x4c2   : > { %v2166_v21 = vpop.eup %2165 }
 0x4c3   : > { %v1716_v36 = vmul.f32 %v2166_v21, %v1692_v19 }
 0x4c5   : > { %v1725_v52 = vmul.f32 %v1974_v49, %v1716_v36 }
 0x4c7   : > { %v1726_v53 = vpack.c.bf16 %v1725_v52, %v1724_v51 }
 0x4c9   : > { %2038 = vmatmul.mubr.msk.bf16.vlgmr.msra.gmra.mxu0 %vm511_vm1, %v1726_v53 }
 0x589   : > { %v1780_v55 = vpop.f32.mrf.mxu0 }
 0x58a   : > { %1787 = vst [vmem:[%s2348_s29] sm:$0xff] %v1780_v55 }
 0x58b   : > { %v2039_v15 = vpop.f32.mrf.mxu0 }
 0x58d   : > { %v1783_v39 = vpop.f32.mrf.mxu0 }
 0x58e   : > { %1788 = vst [vmem:[%s2348_s29 + $0x8] sm:$0xff] %v1783_v39 }
 0x58f   : > { %v2040_v54 = vpop.f32.mrf.mxu0 }
 0x590 PF: > { %s20_s17 = sadd.s32 1, %s2205_s17   ;;  %s2740_s13 = sld [smem:[#allocation3_spill]] }
 0x591   : > { %p17_p9 = scmp.ge.s32.totalorder %s20_s17, 6   ;;  %s2741_s14 = sld [smem:[#allocation4_spill]] }
 0x592   : > { %s2742_s15 = sld [smem:[#allocation5_spill]] }
 0x593   : > { %s2743_s16 = sld [smem:[#allocation6_spill]]  ;;  %19 = sbr.rel (!%p17_p9) target bundleno = 4 (0x4), region = 119 }

</bundles_post_ra>
